<compile_context>
chip_gen: v7x
topology: tpu7x:2x2x1
jax: 0.10.0
libtpu: 0.0.40
codegen_flags: <defaults>
</compile_context>

<pallas_src>
import functools

import jax
import jax.numpy as jnp
from jax.experimental import pallas as pl
from jax.experimental.pallas import tpu as pltpu


# ----------------------------------------------------------------------------
# Tunables
# ----------------------------------------------------------------------------
_TARGET_BLOCK_BYTES = 2 << 20    # ~2 MiB blocks; in+out double-buffered = 8 MiB
_VMEM_LIMIT_BYTES = 32 << 20     # explicit scoped-VMEM limit (safe v5e/v6e/v7x)
_SMALL_INPUT_BYTES = 512 << 10   # below this, plain-jnp fusion wins
_MIN_GRID_STEPS = 4              # overlap + both v7x TensorCores
_REPACK_LANES = 512              # lane-dense slab width for ragged last dims


def _round_up(v, mult):
    return ((v + mult - 1) // mult) * mult


# ----------------------------------------------------------------------------
# Pallas kernel: fused pre_process -> kappa (identity) -> post_process
# ----------------------------------------------------------------------------
def _transformation_kernel(x_ref, o_ref, *, preprocess_fns, postprocess_fns,
                           compute_dtype):
    x = x_ref[...]
    if x.dtype != compute_dtype:
        x = x.astype(compute_dtype)

    for fn in preprocess_fns:        # pre_process hooks
        x = fn(x)

    y = x                            # kappa: identity expansion (D == m)

    for fn in postprocess_fns:       # post_process hooks
        y = fn(y)

    o_ref[...] = y.astype(o_ref.dtype)


# ----------------------------------------------------------------------------
# Tile planning: lane-dense, dtype-aware, >= _MIN_GRID_STEPS grid steps
# ----------------------------------------------------------------------------
def _plan_tiles(rows, cols, store_itemsize, compute_itemsize):
    budget_item = max(store_itemsize, compute_itemsize)   # f32 intermediates
    sub_mult = max(8, 32 // max(store_itemsize, 1))        # sublane packing

    # Small row count (tiny batch, wide m): keep full rows, split along lanes
    # so the grid still has >= _MIN_GRID_STEPS parallel steps (v7x: 2 TCs).
    if rows <= sub_mult:
        tb = rows
        if cols >= 2 * 128 and cols % 128 == 0:
            by_budget = max(
                128,
                (_TARGET_BLOCK_BYTES // max(1, rows * budget_item)) // 128 * 128)
            by_steps = max(128, _round_up(pl.cdiv(cols, _MIN_GRID_STEPS), 128))
            tm = min(cols, by_budget, by_steps)
        else:
            tm = cols
        return tb, tm

    row_bytes = cols * budget_item
    if sub_mult * row_bytes <= _TARGET_BLOCK_BYTES:
        # Full-width rows fit: 1-D grid over rows, unmasked lane-dense stores.
        tm = cols
        by_budget = max(sub_mult,
                        (_TARGET_BLOCK_BYTES // row_bytes) // sub_mult * sub_mult)
        by_steps = max(sub_mult,
                       _round_up(pl.cdiv(rows, _MIN_GRID_STEPS), sub_mult))
        tb = min(by_budget, by_steps)
        return tb, tm

    # Very wide rows: 2-D grid with large lane-dense tiles.
    tm = max(128,
             (_TARGET_BLOCK_BYTES // (sub_mult * budget_item)) // 128 * 128)
    tm = min(tm, _round_up(cols, 128))
    return sub_mult, tm


# ----------------------------------------------------------------------------
# Helpers
# ----------------------------------------------------------------------------
def _hooks_jnp(x, pre, post, compute_dtype=None, out_dtype=None):
    y = x if compute_dtype is None else x.astype(compute_dtype)
    for fn in pre:
        y = fn(y)
    for fn in post:
        y = fn(y)
    return y if out_dtype is None else y.astype(out_dtype)


def _estimate_cost(x2d, pre, post, compute_dtype):
    def composed(v):
        v = v.astype(compute_dtype)
        for fn in pre:
            v = fn(v)
        for fn in post:
            v = fn(v)
        return v.astype(x2d.dtype)

    try:
        return pl.estimate_cost(composed,
                                jax.ShapeDtypeStruct(x2d.shape, x2d.dtype))
    except Exception:
        n = x2d.size
        n_hooks = len(pre) + len(post)
        return pl.CostEstimate(
            flops=n * n_hooks, transcendentals=0,
            bytes_accessed=2 * n * jnp.dtype(x2d.dtype).itemsize)


def _run_pallas(x2d, pre, post, compute_dtype):
    rows, cols = x2d.shape
    store_itemsize = jnp.dtype(x2d.dtype).itemsize
    compute_itemsize = jnp.dtype(compute_dtype).itemsize
    tb, tm = _plan_tiles(rows, cols, store_itemsize, compute_itemsize)

    kernel = functools.partial(
        _transformation_kernel,
        preprocess_fns=pre, postprocess_fns=post, compute_dtype=compute_dtype)

    grid_r = pl.cdiv(rows, tb)
    grid_c = pl.cdiv(cols, tm)
    if grid_c == 1:
        grid = (grid_r,)
        in_specs = [pl.BlockSpec((tb, tm), lambda i: (i, 0))]
        out_specs = pl.BlockSpec((tb, tm), lambda i: (i, 0))
        dims = ("parallel",)
    elif grid_r == 1:
        grid = (grid_c,)
        in_specs = [pl.BlockSpec((tb, tm), lambda j: (0, j))]
        out_specs = pl.BlockSpec((tb, tm), lambda j: (0, j))
        dims = ("parallel",)
    else:
        grid = (grid_r, grid_c)
        in_specs = [pl.BlockSpec((tb, tm), lambda i, j: (i, j))]
        out_specs = pl.BlockSpec((tb, tm), lambda i, j: (i, j))
        dims = ("parallel", "parallel")

    cost = _estimate_cost(x2d, pre, post, compute_dtype)

    return pl.pallas_call(
        kernel,
        out_shape=jax.ShapeDtypeStruct((rows, cols), x2d.dtype),
        grid_spec=pltpu.PrefetchScalarGridSpec(
            num_scalar_prefetch=0, grid=grid,
            in_specs=in_specs, out_specs=out_specs),
        compiler_params=pltpu.CompilerParams(
            dimension_semantics=dims, vmem_limit_bytes=_VMEM_LIMIT_BYTES),
        cost_estimate=cost,
    )(x2d)


# ----------------------------------------------------------------------------
# JAX/Pallas port of tinybig's base `transformation` module
# ----------------------------------------------------------------------------
class Transformation:

    def __init__(self, name="base_transformation",
                 preprocess_functions=None, postprocess_functions=None,
                 preprocess_function_configs=None,
                 postprocess_function_configs=None,
                 device=None, native_low_precision_compute=False,
                 *args, **kwargs):
        # TODO(synk): config-driven hook instantiation & device handling are
        # host-side bookkeeping; hooks must be passed as JAX-traceable callables.
        self.name = name
        self.preprocess_functions = self._norm(preprocess_functions)
        self.postprocess_functions = self._norm(postprocess_functions)
        # Opt-in: keep bf16/fp16 compute (v6e/v7x VPU/EUP are bf16-capable).
        # Default False -> upcast to f32 (required on v5e, safest everywhere).
        self.native_low_precision_compute = native_low_precision_compute

    @staticmethod
    def _norm(fns):
        if fns is None:
            return ()
        if callable(fns):
            return (fns,)
        return tuple(fns)

    def get_name(self):
        return self.name

    def calculate_D(self, m: int) -> int:
        return m  # identity expansion: D == m

    def forward(self, x: jax.Array):
        b, m = x.shape
        D = self.calculate_D(m)
        assert D == m

        pre = self.preprocess_functions
        post = self.postprocess_functions

        # Fast path: identity kappa with no hooks -> pure pass-through.
        # (Note: aliases the input array; numerically identical.)
        if not pre and not post:
            return x

        store_itemsize = jnp.dtype(x.dtype).itemsize
        total_bytes = x.size * store_itemsize

        # Non-float inputs with (possibly float-valued) hooks: plain jnp so
        # dtype promotion follows normal semantics instead of truncating.
        if not jnp.issubdtype(x.dtype, jnp.floating):
            return _hooks_jnp(x, pre, post)

        compute_dtype = x.dtype
        if store_itemsize < 4 and not self.native_low_precision_compute:
            compute_dtype = jnp.float32

        # Tiny inputs: kernel-launch / grid-step overhead dominates; XLA's
        # elementwise fusion is already at roofline.
        if total_bytes < _SMALL_INPUT_BYTES:
            return _hooks_jnp(x, pre, post, compute_dtype, x.dtype)

        # Ragged last dim: repack into a lane-dense slab (elementwise op, so
        # the reshape is free layout plumbing); tiny tail handled in jnp.
        if m % 128 != 0:
            n = x.size
            n_rows = n // _REPACK_LANES
            sub_mult = max(8, 32 // max(store_itemsize, 1))
            if n_rows >= 2 * sub_mult:
                flat = x.reshape(-1)
                n_main = n_rows * _REPACK_LANES
                main = flat[:n_main].reshape(n_rows, _REPACK_LANES)
                main_out = _run_pallas(main, pre, post, compute_dtype).reshape(-1)
                if n_main < n:
                    tail_out = _hooks_jnp(flat[n_main:], pre, post,
                                          compute_dtype, x.dtype)
                    flat_out = jnp.concatenate([main_out, tail_out])
                else:
                    flat_out = main_out
                return flat_out.reshape(b, D)
            return _hooks_jnp(x, pre, post, compute_dtype, x.dtype)

        return _run_pallas(x, pre, post, compute_dtype)

    def __call__(self, x, *args, **kwargs):
        return self.forward(x)


if __name__ == "__main__":
    hooks = dict(preprocess_functions=[jax.nn.sigmoid],
                 postprocess_functions=[lambda v: v * 2.0])

    def ref_fn(v):
        return 2.0 * jax.nn.sigmoid(v.astype(jnp.float32))

    # 1) Default base transformation: no hooks, identity kappa -> fast path.
    x0 = jax.random.normal(jax.random.PRNGKey(0), (16, 256), jnp.float32)
    base = Transformation(name="base_transformation")
    out0 = jax.block_until_ready(base(x0))
    assert out0.shape == (16, base.calculate_D(256))
    assert out0.dtype == x0.dtype
    assert bool(jnp.allclose(out0, x0)), "base transformation must be identity"

    tf = Transformation(name="base_transformation_with_hooks", **hooks)

    # 2) Main Pallas path: full-m lane-dense blocks, 1-D grid with >= 4 steps.
    x1 = jax.random.normal(jax.random.PRNGKey(1), (512, 1024), jnp.float32)
    out1 = jax.block_until_ready(tf(x1))
    assert bool(jnp.allclose(out1, ref_fn(x1), atol=1e-6)), "hooked pipeline mismatch"

    # 3) Ragged last dim -> lane-dense repack + jnp tail.
    x2 = jax.random.normal(jax.random.PRNGKey(2), (1031, 333), jnp.float32)
    out2 = jax.block_until_ready(tf(x2))
    assert out2.shape == x2.shape
    assert bool(jnp.allclose(out2, ref_fn(x2), atol=1e-6)), "ragged repack mismatch"

    # 4) Small batch, wide m -> lane-split grid (engages both v7x TCs).
    x3 = jax.random.normal(jax.random.PRNGKey(3), (4, 32768), jnp.float32)
    out3 = jax.block_until_ready(tf(x3))
    assert bool(jnp.allclose(out3, ref_fn(x3), atol=1e-6)), "lane-split grid mismatch"

    # 5) bf16 input, default f32 compute, single cast at the store.
    xb = jax.random.normal(jax.random.PRNGKey(4), (512, 1024), jnp.bfloat16)
    outb = jax.block_until_ready(tf(xb))
    refb = ref_fn(xb).astype(jnp.bfloat16)
    assert outb.dtype == jnp.bfloat16
    assert bool(jnp.allclose(outb.astype(jnp.float32),
                             refb.astype(jnp.float32), atol=2e-2)), "bf16 mismatch"

    # 6) Opt-in native bf16 compute (bf16-capable VPU/EUP on v6e/v7x).
    tf_bf = Transformation(name="hooked_native_bf16",
                           native_low_precision_compute=True, **hooks)
    outb2 = jax.block_until_ready(tf_bf(xb))
    assert outb2.dtype == jnp.bfloat16
    assert bool(jnp.allclose(outb2.astype(jnp.float32),
                             refb.astype(jnp.float32), atol=4e-2)), "native bf16 mismatch"

    # 7) Tiny input -> plain-jnp fallback (launch overhead dominates).
    x4 = jax.random.normal(jax.random.PRNGKey(5), (16, 256), jnp.float32)
    out4 = jax.block_until_ready(tf(x4))
    assert bool(jnp.allclose(out4, ref_fn(x4), atol=1e-6)), "small-input fallback mismatch"

    print("KERNEL_OK")
</pallas_src>

<mosaic_0001>
module attributes {stable_mosaic.version = 11 : i64} {
  func.func @_transformation_kernel(%arg0: i32, %arg1: memref<128x1024xf32, #tpu.memory_space<vmem>>, %arg2: memref<128x1024xf32, #tpu.memory_space<vmem>>) attributes {dimension_semantics = [#tpu.dimension_semantics<parallel>], iteration_bounds = array<i64: 4>, scalar_prefetch = 0 : i64, scratch_operands = 0 : i64, tpu.core_type = #tpu.core_type<tc>, window_params = [{transform_indices = @transform_0, window_bounds = array<i64: 128, 1024>}, {transform_indices = @transform_1, window_bounds = array<i64: 128, 1024>}]} {
    %c0 = arith.constant 0 : index
    %c0_0 = arith.constant 0 : index
    %0 = vector.load %arg1[%c0, %c0_0] : memref<128x1024xf32, #tpu.memory_space<vmem>>, vector<128x1024xf32>
    %1 = arith.negf %0 : vector<128x1024xf32>
    %2 = math.exp %1 : vector<128x1024xf32>
    %cst = arith.constant 1.000000e+00 : f32
    %3 = vector.broadcast %cst : f32 to vector<128x1024xf32>
    %4 = arith.addf %3, %2 : vector<128x1024xf32>
    %5 = arith.divf %3, %4 : vector<128x1024xf32>
    %cst_1 = arith.constant 2.000000e+00 : f32
    %6 = vector.broadcast %cst_1 : f32 to vector<128x1024xf32>
    %7 = arith.mulf %5, %6 : vector<128x1024xf32>
    %c0_2 = arith.constant 0 : index
    %c0_3 = arith.constant 0 : index
    %8 = vector.load %arg2[%c0_2, %c0_3] : memref<128x1024xf32, #tpu.memory_space<vmem>>, vector<128x1024xf32>
    tpu.vector_store %arg2[%c0_2, %c0_3], %7 {strides = array<i32>} : memref<128x1024xf32, #tpu.memory_space<vmem>>, vector<128x1024xf32>,
    return
  }
  func.func @transform_0(%arg0: i32) -> (i32, i32) {
    %c0_i32 = arith.constant 0 : i32
    %c0_i32_0 = arith.constant 0 : i32
    return %arg0, %c0_i32 : i32, i32
  }
  func.func @transform_1(%arg0: i32) -> (i32, i32) {
    %c0_i32 = arith.constant 0 : i32
    %c0_i32_0 = arith.constant 0 : i32
    return %arg0, %c0_i32 : i32, i32
  }
}

</mosaic_0001>

<bundles_post_ra>
// kernel: tpu_custom_call.1
= control target key start
LH: loop header
LB: loop body
LE: loop exit
PB: predicated region body
PF: predicated region fallthrough
CT: control target
= control target key end

     0   :  { %6 = vsyncpa [#allocation3], 0  ;;  %s2627_s0 = inlined_call_operand.hbm [shape: f32[512,1024], index: 0, kind: input, shape index: {}]   ;;  %s2628_s1 = inlined_call_operand.hbm [shape: f32[512,1024], index: 1, kind: output, shape index: {}]  }
   0x1   :  { %8 = vsyncpa [#allocation3 + $0x1], 0 }
   0x2   :  { %9 = vsyncpa [#allocation4], 0 }
   0x3   :  { %11 = vsyncpa [#allocation4 + $0x1], 0  ;;  %s2202_s6 = smov 0   ;;  %s2204_s7 = smov 0  }
   0x4   :  { %s2206_s8 = smov 0   ;;  %s2208_s9 = smov 0  }
   0x5 LB: > { %s2223_s10 = sadd.s32 4294967295, %s2184_s9   ;;  %s1378_s11 = sadd.s32 4294967294, %s2184_s9   ;;  %s2184_s9 = sphi %s2208_s9, %s2640_s9   ;;  %s2180_s8 = sphi %s2206_s8, %s2639_s8   ;;  %s2176_s7 = sphi %s2204_s7, %s2638_s7   ;;  %s2172_s6 = sphi %s2202_s6, %s2637_s6  }
   0x6   : > { %s2227_s12 = sadd.s32 1, %s2184_s9   ;;  %s24_s13 = sadd.s32 1, %s2180_s8 }
   0x7   : > { %s21_s14 = ssub.s32 %s2184_s9, %s2227_s12  ;;  %p31_p0 = scmp.ne.s32.totalorder %s2180_s8, %s2176_s7 }
   0x8   : > { %p22_p1 = scmp.eq.s32.totalorder %s21_s14, 0  ;;  %p32_p2 = scmp.eq.s32.totalorder %s2184_s9, 0 }
   0x9   : > { %p37_p3 = scmp.ne.s32.totalorder %s2176_s7, %s2172_s6  ;;  %p38_p4 = scmp.eq.s32.totalorder %s2223_s10, 0 }
   0xa   : > { %s2239_s15 = scalar_select %p22_p1, %s2180_s8, %s24_s13  }
   0xb   : > { %p2241_p5 = por %p32_p2, %p31_p0  ;;  %p2245_p6 = por %p38_p4, %p37_p3 }
   0xc   : > { %p61_p7 = scmp.eq.s32.totalorder %s2223_s10, 3  ;;  %p67_p8 = scmp.eq.s32.totalorder %s1378_s11, 3 }
   0xd   : > { %p1538_p9 = scmp.lt.s32.totalorder %s2184_s9, 4  ;;  %s87_s20 = sand.u32 1, %s2180_s8  }
   0xe   : > { %p2251_p10 = por %p61_p7, %p31_p0  ;;  %p2255_p11 = por %p67_p8, %p37_p3 }
   0xf   : > { %s1523_s21 = sshll.u32 %s2184_s9, 14  ;;  %s1381_s22 = sshll.u32 %s87_s20, 10 }
  0x10   : > { %s2632_s18 = scalar_select %p2251_p10, 1, 0 }
  0x11   : > { %s2633_s19 = scalar_select %p2255_p11, 1, 0 }
  0x12   : > { %s2264_s25 = scalar_lea.hbm %s2627_s0, %s1523_s21  ;;  %s91_s26 = scalar_lea.vmem [#allocation2], %s1381_s22 }
  0x13   : > { %s99_s27 = sshll.u32 %s91_s26, 4  ;;  %p2268_p12 = pnand %p1538_p9, %p2241_p5  ;;  %s2272_s27 = int_to_ptr.vmem [resolvable:$true] %s99_s27 }
  0x14   : > { %s2274_s29 = scalar_lea.sflag [#allocation3], %s87_s20  ;;  %s2088_s30 = scalar_lea.hbm %s2264_s25, 16384 }
  0x15   : > { %p2089_p13 = scmp.ne.s32.totalorder %s2264_s25, %s2088_s30  ;;  %p2090_p0 = pneg %p2268_p12 }
  0x16   : > { %s2093_s4 = scalar_lea.hbm %s2627_s0, 65536  ;;  %p2094_p3 = scmp.lt.u32.totalorder %s2264_s25, %s2627_s0 }
  0x17   : > { %p2091_p1 = pnand %p2090_p0, %p2089_p13  ;;  %p2095_p4 = scmp.lt.u32.totalorder %s2093_s4, %s2088_s30 }
  0x18   : > { %p2097_p7 = scmp.lt.u32.totalorder %s2088_s30, %s2264_s25 }
  0x19   : > { %p2092_p2 = pneg %p2091_p1  ;;  %p2096_p5 = por %p2095_p4, %p2094_p3 }
  0x1b   : > { %p2098_p8 = por %p2097_p7, %p2096_p5 }
  0x1d   : > { %p2099_p9 = pnand %p2098_p8, %p2092_p2 }
  0x1f   : > { %2102 = shalt.err (!%p2099_p9)
}
  0x20   : > { %s2103_s13 = scalar_lea.vmem %s2272_s27, 16384  ;;  %s2186_s14 = smov [#allocation2]  }
  0x21   : > { %p2104_p13 = scmp.ne.s32.totalorder %s2272_s27, %s2103_s13  ;;  %s2108_s16 = sshll.u32 %s2186_s14, 4  ;;  %s2109_s16 = int_to_ptr.vmem [resolvable:$false] %s2108_s16 }
  0x22   : > { %s2110_s20 = scalar_lea.vmem %s2109_s16, 32768  ;;  %p2111_p10 = scmp.lt.s32.totalorder %s2272_s27, %s2109_s16 }
  0x23   : > { %p2106_p1 = pnand %p2104_p13, %p2090_p0  ;;  %p2112_p3 = scmp.lt.s32.totalorder %s2110_s20, %s2103_s13 }
  0x25   : > { %p2107_p11 = pneg %p2106_p1  ;;  %p2113_p4 = por %p2112_p3, %p2111_p10 }
  0x27   : > { %p2114_p5 = pnand %p2113_p4, %p2107_p11 }
  0x29   : > { %2117 = shalt.err (!%p2114_p5)
}
  0x2a   : > { %s2187_s21 = smov 1024   ;;  %s2188_s22 = smov 64  }
  0x2b   : > { %1533 = dma.hbm_to_vmem [thread:$0]  (!%p2268_p12), %s2264_s25, 16384, %s2272_s27, %s2274_s29, %s2187_s21, %s2187_s21, %s2188_s22  }
  0x2c   : > { %p1385_p0 = scmp.ge.s32.totalorder %s2184_s9, 1  ;;  %p107_p2 = scmp.lt.s32.totalorder %s2184_s9, 5 }
  0x2e   : > { %p108_p7 = pnand %p1385_p0, %p107_p2 }
  0x2f   : > { %s2305_s23 = sand.u32 (!%p108_p7), 1, %s2176_s7  }
  0x30   : > { %111 = sbr.rel (%p108_p7) target bundleno = 344 (0x158), region = 24  ;;  %s1386_s24 = sshll.u32 (!%p108_p7), %s2305_s23, 10 }
  0x31   : > { %s114_s26 = scalar_lea.sflag (!%p108_p7), [#allocation3], %s2305_s23  ;;  %s2311_s30 = scalar_lea.vmem (!%p108_p7), [#allocation2], %s1386_s24 }
  0x37   : > { %2163 = dma.done.wait (%p2245_p6), %s114_s26, 16384  }
  0x38   : > { %2165 = vsyncadd (%p2245_p6), %s114_s26, 4294950912  ;;  %v138_v0 = vld [vmem:[%s2311_s30] sm:$0xff]  ;;  %v139_v1 = vld [vmem:[%s2311_s30 + $0x8] sm:$0xff]  ;;  %s2339_s17 = scalar_lea.vmem [#allocation5], %s1386_s24  ;;  %s1525_s25 = sshll.u32 %s2223_s10, 14 }
  0x39   : > { %v140_v2 = vld [vmem:[%s2311_s30 + $0x10] sm:$0xff]  ;;  %v1388_v3 = vmul.f32 -1.442695, %v138_v0  ;;  %v1389_v4 = vmul.f32 -1.442695, %v139_v1  ;;  %v141_v6 = vld [vmem:[%s2311_s30 + $0x18] sm:$0xff]  ;;  %s2579_s2 = scalar_lea.hbm %s2628_s1, %s1525_s25 }
  0x3a   : > { %v1390_v5 = vmul.f32 -1.442695, %v140_v2  ;;  %v142_v7 = vld [vmem:[%s2311_s30 + $0x20] sm:$0xff]  ;;  %v143_v8 = vld [vmem:[%s2311_s30 + $0x28] sm:$0xff]  ;;  %v1391_v9 = vmul.f32 -1.442695, %v141_v6 }
  0x3b   : > { %1576 = vpow2.f32 %v1388_v3  ;;  %v1392_v10 = vmul.f32 -1.442695, %v142_v7  ;;  %v1393_v11 = vmul.f32 -1.442695, %v143_v8  ;;  %v144_v12 = vld [vmem:[%s2311_s30 + $0x30] sm:$0xff]  ;;  %v145_v13 = vld [vmem:[%s2311_s30 + $0x38] sm:$0xff] }
  0x3c   : > { %1578 = vpow2.f32 %v1389_v4  ;;  %v146_v14 = vld [vmem:[%s2311_s30 + $0x40] sm:$0xff]  ;;  %v1394_v15 = vmul.f32 -1.442695, %v144_v12  ;;  %v1395_v16 = vmul.f32 -1.442695, %v145_v13  ;;  %v147_v17 = vld [vmem:[%s2311_s30 + $0x48] sm:$0xff] }
  0x3d   : > { %1580 = vpow2.f32 %v1390_v5  ;;  %v148_v18 = vld [vmem:[%s2311_s30 + $0x50] sm:$0xff]  ;;  %v1396_v19 = vmul.f32 -1.442695, %v146_v14  ;;  %v149_v20 = vld [vmem:[%s2311_s30 + $0x58] sm:$0xff]  ;;  %v1397_v21 = vmul.f32 -1.442695, %v147_v17 }
  0x3e   : > { %1582 = vpow2.f32 %v1391_v9  ;;  %v150_v22 = vld [vmem:[%s2311_s30 + $0x60] sm:$0xff]  ;;  %v1398_v23 = vmul.f32 -1.442695, %v148_v18  ;;  %v1399_v24 = vmul.f32 -1.442695, %v149_v20  ;;  %v151_v45 = vld [vmem:[%s2311_s30 + $0x68] sm:$0xff] }
  0x3f   : > { %1584 = vpow2.f32 %v1392_v10  ;;  %v1400_v25 = vmul.f32 -1.442695, %v150_v22  ;;  %v152_v48 = vld [vmem:[%s2311_s30 + $0x70] sm:$0xff]  ;;  %v153_v51 = vld [vmem:[%s2311_s30 + $0x78] sm:$0xff]  ;;  %v1401_v54 = vmul.f32 -1.442695, %v151_v45 }
  0x40   : > { %1586 = vpow2.f32 %v1393_v11  ;;  %v154_v55 = vld [vmem:[%s2311_s30 + $0x80] sm:$0xff]  ;;  %v1402_v58 = vmul.f32 -1.442695, %v152_v48  ;;  %v155_v59 = vld [vmem:[%s2311_s30 + $0x88] sm:$0xff]  ;;  %v1403_v62 = vmul.f32 -1.442695, %v153_v51 }
  0x41   : > { %1588 = vpow2.f32 %v1394_v15  ;;  %v156_v63 = vld [vmem:[%s2311_s30 + $0x90] sm:$0xff]  ;;  %v1404_v2 = vmul.f32 -1.442695, %v154_v55  ;;  %v157_v3 = vld [vmem:[%s2311_s30 + $0x98] sm:$0xff]  ;;  %v1405_v6 = vmul.f32 -1.442695, %v155_v59 }
  0x42   : > { %1590 = vpow2.f32 %v1395_v16  ;;  %v158_v7 = vld [vmem:[%s2311_s30 + $0xa0] sm:$0xff]  ;;  %v1406_v10 = vmul.f32 -1.442695, %v156_v63  ;;  %v159_v11 = vld [vmem:[%s2311_s30 + $0xa8] sm:$0xff]  ;;  %v1407_v14 = vmul.f32 -1.442695, %v157_v3 }
  0x43   : > { %1592 = vpow2.f32 %v1396_v19  ;;  %v160_v15 = vld [vmem:[%s2311_s30 + $0xb0] sm:$0xff]  ;;  %v1408_v18 = vmul.f32 -1.442695, %v158_v7  ;;  %v161_v19 = vld [vmem:[%s2311_s30 + $0xb8] sm:$0xff]  ;;  %v1409_v22 = vmul.f32 -1.442695, %v159_v11 }
  0x44   : > { %1594 = vpow2.f32 %v1397_v21  ;;  %v164_v59 = vld [vmem:[%s2311_s30 + $0xd0] sm:$0xff]  ;;  %s1305_s27 = sshll.u32 %s2339_s17, 4  ;;  %s1291_s10 = scalar_lea.sflag [#allocation4], %s2305_s23  ;;  %s2581_s27 = int_to_ptr.vmem [resolvable:$true] %s1305_s27 }
  0x45   : > { %v1577_v26 = vpop.eup %1576  ;;  %1596 = vpow2.f32 %v1398_v23  ;;  %v162_v23 = vld [vmem:[%s2311_s30 + $0xc0] sm:$0xff]  ;;  %s2118_s3 = scalar_lea.vmem %s2581_s27, 16384  ;;  %p2635_p10 = scmp.ne.s32.totalorder %s2632_s18, 0 }
  0x46   : > { %v1579_v27 = vpop.eup %1578  ;;  %v650_v28 = vadd.f32 1.0, %v1577_v26  ;;  %1598 = vpow2.f32 %v1399_v24  ;;  %v1410_v26 = vmul.f32 -1.442695, %v160_v15  ;;  %p2119_p6 = scmp.ne.s32.totalorder %s2581_s27, %s2118_s3  ;;  %s2189_s4 = smov [#allocation5]  }
  0x47   : > { %v1581_v29 = vpop.eup %1580  ;;  %v651_v30 = vadd.f32 1.0, %v1579_v27  ;;  %1600 = vpow2.f32 %v1400_v25  ;;  %v163_v27 = vld [vmem:[%s2311_s30 + $0xc8] sm:$0xff]  ;;  %s2122_s5 = sshll.u32 %s2189_s4, 4  ;;  %s2123_s5 = int_to_ptr.vmem [resolvable:$false] %s2122_s5 }
  0x48   : > { %v1583_v31 = vpop.eup %1582  ;;  %1602 = vrcp.f32 %v650_v28  ;;  %v652_v32 = vadd.f32 1.0, %v1581_v29  ;;  %p2120_p11 = pnand %p2119_p6, %p2635_p10  ;;  %s2124_s11 = scalar_lea.vmem %s2123_s5, 32768 }
  0x49   : > { %v1585_v33 = vpop.eup %1584  ;;  %1604 = vrcp.f32 %v651_v30  ;;  %v653_v34 = vadd.f32 1.0, %v1583_v31  ;;  %v1411_v30 = vmul.f32 -1.442695, %v161_v19  ;;  %p2125_p8 = scmp.lt.s32.totalorder %s2581_s27, %s2123_s5  ;;  %p2126_p9 = scmp.lt.s32.totalorder %s2124_s11, %s2118_s3 }
  0x4a   : > { %v1587_v35 = vpop.eup %1586  ;;  %1606 = vrcp.f32 %v652_v32  ;;  %v654_v36 = vadd.f32 1.0, %v1585_v33  ;;  %v1412_v33 = vmul.f32 -1.442695, %v162_v23  ;;  %p2121_p12 = pneg %p2120_p11 }
  0x4b   : > { %v1589_v37 = vpop.eup %1588  ;;  %1608 = vrcp.f32 %v653_v34  ;;  %v655_v38 = vadd.f32 1.0, %v1587_v35  ;;  %p2127_p13 = por %p2126_p9, %p2125_p8 }
  0x4c   : > { %v1591_v39 = vpop.eup %1590  ;;  %1610 = vrcp.f32 %v654_v36  ;;  %v656_v40 = vadd.f32 1.0, %v1589_v37  ;;  %v1413_v36 = vmul.f32 -1.442695, %v163_v27 }
  0x4d   : > { %v1593_v41 = vpop.eup %1592  ;;  %1612 = vrcp.f32 %v655_v38  ;;  %v657_v42 = vadd.f32 1.0, %v1591_v39  ;;  %p2128_p1 = pnand %p2127_p13, %p2121_p12 }
  0x4e   : > { %v1595_v43 = vpop.eup %1594  ;;  %1614 = vrcp.f32 %v656_v40  ;;  %v658_v44 = vadd.f32 1.0, %v1593_v41 }
  0x4f   : > { %v1597_v46 = vpop.eup %1596  ;;  %1616 = vrcp.f32 %v657_v42  ;;  %v659_v47 = vadd.f32 1.0, %v1595_v43 }
  0x50   : > { %v1599_v49 = vpop.eup %1598  ;;  %1618 = vrcp.f32 %v658_v44  ;;  %v660_v50 = vadd.f32 1.0, %v1597_v46 }
  0x51   : > { %v1601_v52 = vpop.eup %1600  ;;  %1620 = vrcp.f32 %v659_v47  ;;  %v661_v53 = vadd.f32 1.0, %v1599_v49 }
  0x52   : > { %v1603_v56 = vpop.eup %1602  ;;  %1622 = vrcp.f32 %v660_v50  ;;  %v662_v57 = vadd.f32 1.0, %v1601_v52 }
  0x53   : > { %v1605_v60 = vpop.eup %1604  ;;  %v1034_v61 = vmul.f32 2.0, %v1603_v56  ;;  %1624 = vrcp.f32 %v661_v53 }
  0x54   : > { %v1607_v0 = vpop.eup %1606  ;;  %v1035_v1 = vmul.f32 2.0, %v1605_v60  ;;  %1626 = vrcp.f32 %v662_v57 }
  0x55   : > { %v1609_v4 = vpop.eup %1608  ;;  %1162 = vst [vmem:[%s2339_s17] sm:$0xff] %v1034_v61  ;;  %v1036_v5 = vmul.f32 2.0, %v1607_v0  ;;  %1628 = vpow2.f32 %v1401_v54 }
  0x56   : > { %v1611_v8 = vpop.eup %1610  ;;  %1163 = vst [vmem:[%s2339_s17 + $0x8] sm:$0xff] %v1035_v1  ;;  %v1037_v9 = vmul.f32 2.0, %v1609_v4  ;;  %1630 = vpow2.f32 %v1402_v58  ;;  %v166_v1 = vld [vmem:[%s2311_s30 + $0xe0] sm:$0xff]  ;;  %v1414_v4 = vmul.f32 -1.442695, %v164_v59 }
  0x57   : > { %v1613_v12 = vpop.eup %1612  ;;  %1164 = vst [vmem:[%s2339_s17 + $0x10] sm:$0xff] %v1036_v5  ;;  %v1038_v13 = vmul.f32 2.0, %v1611_v8  ;;  %1632 = vpow2.f32 %v1403_v62  ;;  %v165_v62 = vld [vmem:[%s2311_s30 + $0xd8] sm:$0xff]  ;;  %v167_v5 = vld [vmem:[%s2311_s30 + $0xe8] sm:$0xff] }
  0x58   : > { %v1615_v16 = vpop.eup %1614  ;;  %1165 = vst [vmem:[%s2339_s17 + $0x18] sm:$0xff] %v1037_v9  ;;  %v1039_v17 = vmul.f32 2.0, %v1613_v12  ;;  %1634 = vpow2.f32 %v1404_v2  ;;  %v1415_v8 = vmul.f32 -1.442695, %v165_v62  ;;  %v168_v9 = vld [vmem:[%s2311_s30 + $0xf0] sm:$0xff] }
  0x59   : > { %v1617_v20 = vpop.eup %1616  ;;  %1166 = vst [vmem:[%s2339_s17 + $0x20] sm:$0xff] %v1038_v13  ;;  %v1040_v21 = vmul.f32 2.0, %v1615_v16  ;;  %1636 = vpow2.f32 %v1405_v6  ;;  %v1416_v12 = vmul.f32 -1.442695, %v166_v1  ;;  %v169_v13 = vld [vmem:[%s2311_s30 + $0xf8] sm:$0xff] }
  0x5a   : > { %v1619_v24 = vpop.eup %1618  ;;  %1167 = vst [vmem:[%s2339_s17 + $0x28] sm:$0xff] %v1039_v17  ;;  %v1041_v25 = vmul.f32 2.0, %v1617_v20  ;;  %1638 = vpow2.f32 %v1406_v10  ;;  %v1417_v16 = vmul.f32 -1.442695, %v167_v5  ;;  %v170_v17 = vld [vmem:[%s2311_s30 + $0x100] sm:$0xff] }
  0x5b   : > { %v1621_v28 = vpop.eup %1620  ;;  %1168 = vst [vmem:[%s2339_s17 + $0x30] sm:$0xff] %v1040_v21  ;;  %v1042_v29 = vmul.f32 2.0, %v1619_v24  ;;  %1640 = vpow2.f32 %v1407_v14  ;;  %v1418_v20 = vmul.f32 -1.442695, %v168_v9  ;;  %v171_v21 = vld [vmem:[%s2311_s30 + $0x108] sm:$0xff]  ;;  %v177_v9 = vld [vmem:[%s2311_s30 + $0x138] sm:$0xff] }
  0x5c   : > { %v1623_v31 = vpop.eup %1622  ;;  %1169 = vst [vmem:[%s2339_s17 + $0x38] sm:$0xff] %v1041_v25  ;;  %v1043_v32 = vmul.f32 2.0, %v1621_v28  ;;  %1642 = vpow2.f32 %v1408_v18  ;;  %v1419_v24 = vmul.f32 -1.442695, %v169_v13  ;;  %v172_v25 = vld [vmem:[%s2311_s30 + $0x110] sm:$0xff] }
  0x5d   : > { %v1625_v34 = vpop.eup %1624  ;;  %1170 = vst [vmem:[%s2339_s17 + $0x40] sm:$0xff] %v1042_v29  ;;  %v1044_v35 = vmul.f32 2.0, %v1623_v31  ;;  %1644 = vpow2.f32 %v1409_v22  ;;  %v1420_v28 = vmul.f32 -1.442695, %v170_v17  ;;  %v173_v29 = vld [vmem:[%s2311_s30 + $0x118] sm:$0xff] }
  0x5e   : > { %v1627_v37 = vpop.eup %1626  ;;  %1171 = vst [vmem:[%s2339_s17 + $0x48] sm:$0xff] %v1043_v32  ;;  %v1045_v38 = vmul.f32 2.0, %v1625_v34  ;;  %1646 = vpow2.f32 %v1410_v26  ;;  %v1421_v32 = vmul.f32 -1.442695, %v171_v21 }
  0x5f   : > { %v1629_v39 = vpop.eup %1628  ;;  %1172 = vst [vmem:[%s2339_s17 + $0x50] sm:$0xff] %v1044_v35  ;;  %v1046_v40 = vmul.f32 2.0, %v1627_v37  ;;  %1648 = vpow2.f32 %v1411_v30  ;;  %v175_v37 = vld [vmem:[%s2311_s30 + $0x128] sm:$0xff] }
  0x60   : > { %v1631_v41 = vpop.eup %1630  ;;  %1173 = vst [vmem:[%s2339_s17 + $0x58] sm:$0xff] %v1045_v38  ;;  %v663_v42 = vadd.f32 1.0, %v1629_v39  ;;  %1650 = vpow2.f32 %v1412_v33  ;;  %v174_v33 = vld [vmem:[%s2311_s30 + $0x120] sm:$0xff] }
  0x61   : > { %v1633_v43 = vpop.eup %1632  ;;  %1174 = vst [vmem:[%s2339_s17 + $0x60] sm:$0xff] %v1046_v40  ;;  %v664_v44 = vadd.f32 1.0, %v1631_v41  ;;  %1652 = vpow2.f32 %v1413_v36  ;;  %v1422_v36 = vmul.f32 -1.442695, %v172_v25  ;;  %v1423_v40 = vmul.f32 -1.442695, %v173_v29 }
  0x62   : > { %v1635_v45 = vpop.eup %1634  ;;  %1654 = vrcp.f32 %v663_v42  ;;  %v665_v46 = vadd.f32 1.0, %v1633_v43  ;;  %v176_v41 = vld [vmem:[%s2311_s30 + $0x130] sm:$0xff] }
  0x63   : > { %v1637_v47 = vpop.eup %1636  ;;  %1656 = vrcp.f32 %v664_v44  ;;  %v666_v48 = vadd.f32 1.0, %v1635_v45  ;;  %v1424_v44 = vmul.f32 -1.442695, %v174_v33 }
  0x64   : > { %v1639_v49 = vpop.eup %1638  ;;  %1658 = vrcp.f32 %v665_v46  ;;  %v667_v50 = vadd.f32 1.0, %v1637_v47  ;;  %v1425_v47 = vmul.f32 -1.442695, %v175_v37 }
  0x65   : > { %v1641_v51 = vpop.eup %1640  ;;  %1660 = vrcp.f32 %v666_v48  ;;  %v668_v52 = vadd.f32 1.0, %v1639_v49 }
  0x66   : > { %v1643_v53 = vpop.eup %1642  ;;  %1662 = vrcp.f32 %v667_v50  ;;  %v669_v54 = vadd.f32 1.0, %v1641_v51  ;;  %v1426_v50 = vmul.f32 -1.442695, %v176_v41 }
  0x67   : > { %v1645_v55 = vpop.eup %1644  ;;  %1664 = vrcp.f32 %v668_v52  ;;  %v670_v56 = vadd.f32 1.0, %v1643_v53 }
  0x68   : > { %v1647_v57 = vpop.eup %1646  ;;  %1666 = vrcp.f32 %v669_v54  ;;  %v671_v58 = vadd.f32 1.0, %v1645_v55 }
  0x69   : > { %v1649_v60 = vpop.eup %1648  ;;  %1668 = vrcp.f32 %v670_v56  ;;  %v672_v61 = vadd.f32 1.0, %v1647_v57 }
  0x6a   : > { %v1651_v63 = vpop.eup %1650  ;;  %1670 = vrcp.f32 %v671_v58  ;;  %v673_v0 = vadd.f32 1.0, %v1649_v60 }
  0x6b   : > { %v1653_v2 = vpop.eup %1652  ;;  %1672 = vrcp.f32 %v672_v61  ;;  %v674_v3 = vadd.f32 1.0, %v1651_v63 }
  0x6c   : > { %v1655_v6 = vpop.eup %1654  ;;  %1674 = vrcp.f32 %v673_v0  ;;  %v675_v7 = vadd.f32 1.0, %v1653_v2 }
  0x6d   : > { %v1657_v10 = vpop.eup %1656  ;;  %v1047_v11 = vmul.f32 2.0, %v1655_v6  ;;  %1676 = vrcp.f32 %v674_v3 }
  0x6e   : > { %v1659_v14 = vpop.eup %1658  ;;  %v1048_v15 = vmul.f32 2.0, %v1657_v10  ;;  %1678 = vrcp.f32 %v675_v7 }
  0x6f   : > { %v1661_v18 = vpop.eup %1660  ;;  %1175 = vst [vmem:[%s2339_s17 + $0x68] sm:$0xff] %v1047_v11  ;;  %v1049_v19 = vmul.f32 2.0, %v1659_v14  ;;  %1680 = vpow2.f32 %v1414_v4 }
  0x70   : > { %v1663_v22 = vpop.eup %1662  ;;  %1176 = vst [vmem:[%s2339_s17 + $0x70] sm:$0xff] %v1048_v15  ;;  %v1050_v23 = vmul.f32 2.0, %v1661_v18  ;;  %1682 = vpow2.f32 %v1415_v8  ;;  %v179_v15 = vld [vmem:[%s2311_s30 + $0x148] sm:$0xff]  ;;  %v1427_v18 = vmul.f32 -1.442695, %v177_v9 }
  0x71   : > { %v1665_v26 = vpop.eup %1664  ;;  %1177 = vst [vmem:[%s2339_s17 + $0x78] sm:$0xff] %v1049_v19  ;;  %v1051_v27 = vmul.f32 2.0, %v1663_v22  ;;  %1684 = vpow2.f32 %v1416_v12  ;;  %v178_v12 = vld [vmem:[%s2311_s30 + $0x140] sm:$0xff]  ;;  %v180_v19 = vld [vmem:[%s2311_s30 + $0x150] sm:$0xff] }
  0x72   : > { %v1667_v30 = vpop.eup %1666  ;;  %1178 = vst [vmem:[%s2339_s17 + $0x80] sm:$0xff] %v1050_v23  ;;  %v1052_v31 = vmul.f32 2.0, %v1665_v26  ;;  %1686 = vpow2.f32 %v1417_v16  ;;  %v1428_v22 = vmul.f32 -1.442695, %v178_v12  ;;  %v181_v23 = vld [vmem:[%s2311_s30 + $0x158] sm:$0xff] }
  0x73   : > { %v1669_v34 = vpop.eup %1668  ;;  %1179 = vst [vmem:[%s2339_s17 + $0x88] sm:$0xff] %v1051_v27  ;;  %v1053_v35 = vmul.f32 2.0, %v1667_v30  ;;  %1688 = vpow2.f32 %v1418_v20  ;;  %v1429_v26 = vmul.f32 -1.442695, %v179_v15  ;;  %v182_v27 = vld [vmem:[%s2311_s30 + $0x160] sm:$0xff] }
  0x74   : > { %v1671_v38 = vpop.eup %1670  ;;  %1180 = vst [vmem:[%s2339_s17 + $0x90] sm:$0xff] %v1052_v31  ;;  %v1054_v39 = vmul.f32 2.0, %v1669_v34  ;;  %1690 = vpow2.f32 %v1419_v24  ;;  %v1430_v30 = vmul.f32 -1.442695, %v180_v19  ;;  %v183_v31 = vld [vmem:[%s2311_s30 + $0x168] sm:$0xff] }
  0x75   : > { %v1673_v42 = vpop.eup %1672  ;;  %1181 = vst [vmem:[%s2339_s17 + $0x98] sm:$0xff] %v1053_v35  ;;  %v1055_v43 = vmul.f32 2.0, %v1671_v38  ;;  %1692 = vpow2.f32 %v1420_v28  ;;  %v1431_v34 = vmul.f32 -1.442695, %v181_v23  ;;  %v184_v35 = vld [vmem:[%s2311_s30 + $0x170] sm:$0xff]  ;;  %v190_v23 = vld [vmem:[%s2311_s30 + $0x1a0] sm:$0xff] }
  0x76   : > { %v1675_v45 = vpop.eup %1674  ;;  %1182 = vst [vmem:[%s2339_s17 + $0xa0] sm:$0xff] %v1054_v39  ;;  %v1056_v46 = vmul.f32 2.0, %v1673_v42  ;;  %1694 = vpow2.f32 %v1421_v32  ;;  %v1432_v38 = vmul.f32 -1.442695, %v182_v27  ;;  %v185_v39 = vld [vmem:[%s2311_s30 + $0x178] sm:$0xff] }
  0x77   : > { %v1677_v48 = vpop.eup %1676  ;;  %1183 = vst [vmem:[%s2339_s17 + $0xa8] sm:$0xff] %v1055_v43  ;;  %v1057_v49 = vmul.f32 2.0, %v1675_v45  ;;  %1696 = vpow2.f32 %v1422_v36  ;;  %v1433_v42 = vmul.f32 -1.442695, %v183_v31  ;;  %v186_v43 = vld [vmem:[%s2311_s30 + $0x180] sm:$0xff] }
  0x78   : > { %v1679_v51 = vpop.eup %1678  ;;  %1184 = vst [vmem:[%s2339_s17 + $0xb0] sm:$0xff] %v1056_v46  ;;  %v1058_v52 = vmul.f32 2.0, %v1677_v48  ;;  %1698 = vpow2.f32 %v1423_v40  ;;  %v1434_v46 = vmul.f32 -1.442695, %v184_v35 }
  0x79   : > { %v1681_v53 = vpop.eup %1680  ;;  %1185 = vst [vmem:[%s2339_s17 + $0xb8] sm:$0xff] %v1057_v49  ;;  %v1059_v54 = vmul.f32 2.0, %v1679_v51  ;;  %1700 = vpow2.f32 %v1424_v44  ;;  %v188_v51 = vld [vmem:[%s2311_s30 + $0x190] sm:$0xff] }
  0x7a   : > { %v1683_v55 = vpop.eup %1682  ;;  %1186 = vst [vmem:[%s2339_s17 + $0xc0] sm:$0xff] %v1058_v52  ;;  %v676_v56 = vadd.f32 1.0, %v1681_v53  ;;  %1702 = vpow2.f32 %v1425_v47  ;;  %v187_v47 = vld [vmem:[%s2311_s30 + $0x188] sm:$0xff] }
  0x7b   : > { %v1685_v57 = vpop.eup %1684  ;;  %1187 = vst [vmem:[%s2339_s17 + $0xc8] sm:$0xff] %v1059_v54  ;;  %v677_v58 = vadd.f32 1.0, %v1683_v55  ;;  %1704 = vpow2.f32 %v1426_v50  ;;  %v1435_v50 = vmul.f32 -1.442695, %v185_v39  ;;  %v1436_v54 = vmul.f32 -1.442695, %v186_v43 }
  0x7c   : > { %v1687_v59 = vpop.eup %1686  ;;  %1706 = vrcp.f32 %v676_v56  ;;  %v678_v60 = vadd.f32 1.0, %v1685_v57  ;;  %v189_v55 = vld [vmem:[%s2311_s30 + $0x198] sm:$0xff] }
  0x7d   : > { %v1689_v61 = vpop.eup %1688  ;;  %1708 = vrcp.f32 %v677_v58  ;;  %v679_v62 = vadd.f32 1.0, %v1687_v59  ;;  %v1437_v58 = vmul.f32 -1.442695, %v187_v47 }
  0x7e   : > { %v1691_v63 = vpop.eup %1690  ;;  %1710 = vrcp.f32 %v678_v60  ;;  %v680_v0 = vadd.f32 1.0, %v1689_v61  ;;  %v1438_v61 = vmul.f32 -1.442695, %v188_v51 }
  0x7f   : > { %v1693_v1 = vpop.eup %1692  ;;  %1712 = vrcp.f32 %v679_v62  ;;  %v681_v2 = vadd.f32 1.0, %v1691_v63 }
  0x80   : > { %v1695_v3 = vpop.eup %1694  ;;  %1714 = vrcp.f32 %v680_v0  ;;  %v682_v4 = vadd.f32 1.0, %v1693_v1  ;;  %v1439_v0 = vmul.f32 -1.442695, %v189_v55 }
  0x81   : > { %v1697_v5 = vpop.eup %1696  ;;  %1716 = vrcp.f32 %v681_v2  ;;  %v683_v6 = vadd.f32 1.0, %v1695_v3 }
  0x82   : > { %v1699_v7 = vpop.eup %1698  ;;  %1718 = vrcp.f32 %v682_v4  ;;  %v684_v8 = vadd.f32 1.0, %v1697_v5 }
  0x83   : > { %v1701_v10 = vpop.eup %1700  ;;  %1720 = vrcp.f32 %v683_v6  ;;  %v685_v11 = vadd.f32 1.0, %v1699_v7 }
  0x84   : > { %v1703_v13 = vpop.eup %1702  ;;  %1722 = vrcp.f32 %v684_v8  ;;  %v686_v14 = vadd.f32 1.0, %v1701_v10 }
  0x85   : > { %v1705_v16 = vpop.eup %1704  ;;  %1724 = vrcp.f32 %v685_v11  ;;  %v687_v17 = vadd.f32 1.0, %v1703_v13 }
  0x86   : > { %v1707_v20 = vpop.eup %1706  ;;  %1726 = vrcp.f32 %v686_v14  ;;  %v688_v21 = vadd.f32 1.0, %v1705_v16 }
  0x87   : > { %v1709_v24 = vpop.eup %1708  ;;  %v1060_v25 = vmul.f32 2.0, %v1707_v20  ;;  %1728 = vrcp.f32 %v687_v17 }
  0x88   : > { %v1711_v28 = vpop.eup %1710  ;;  %v1061_v29 = vmul.f32 2.0, %v1709_v24  ;;  %1730 = vrcp.f32 %v688_v21 }
  0x89   : > { %v1713_v32 = vpop.eup %1712  ;;  %1188 = vst [vmem:[%s2339_s17 + $0xd0] sm:$0xff] %v1060_v25  ;;  %v1062_v33 = vmul.f32 2.0, %v1711_v28  ;;  %1732 = vpow2.f32 %v1427_v18 }
  0x8a   : > { %v1715_v36 = vpop.eup %1714  ;;  %1189 = vst [vmem:[%s2339_s17 + $0xd8] sm:$0xff] %v1061_v29  ;;  %v1063_v37 = vmul.f32 2.0, %v1713_v32  ;;  %1734 = vpow2.f32 %v1428_v22  ;;  %v192_v29 = vld [vmem:[%s2311_s30 + $0x1b0] sm:$0xff]  ;;  %v1440_v32 = vmul.f32 -1.442695, %v190_v23 }
  0x8b   : > { %v1717_v40 = vpop.eup %1716  ;;  %1190 = vst [vmem:[%s2339_s17 + $0xe0] sm:$0xff] %v1062_v33  ;;  %v1064_v41 = vmul.f32 2.0, %v1715_v36  ;;  %1736 = vpow2.f32 %v1429_v26  ;;  %v191_v26 = vld [vmem:[%s2311_s30 + $0x1a8] sm:$0xff]  ;;  %v193_v33 = vld [vmem:[%s2311_s30 + $0x1b8] sm:$0xff] }
  0x8c   : > { %v1719_v44 = vpop.eup %1718  ;;  %1191 = vst [vmem:[%s2339_s17 + $0xe8] sm:$0xff] %v1063_v37  ;;  %v1065_v45 = vmul.f32 2.0, %v1717_v40  ;;  %1738 = vpow2.f32 %v1430_v30  ;;  %v1441_v36 = vmul.f32 -1.442695, %v191_v26  ;;  %v194_v37 = vld [vmem:[%s2311_s30 + $0x1c0] sm:$0xff] }
  0x8d   : > { %v1721_v48 = vpop.eup %1720  ;;  %1192 = vst [vmem:[%s2339_s17 + $0xf0] sm:$0xff] %v1064_v41  ;;  %v1066_v49 = vmul.f32 2.0, %v1719_v44  ;;  %1740 = vpow2.f32 %v1431_v34  ;;  %v1442_v40 = vmul.f32 -1.442695, %v192_v29  ;;  %v195_v41 = vld [vmem:[%s2311_s30 + $0x1c8] sm:$0xff] }
  0x8e   : > { %v1723_v52 = vpop.eup %1722  ;;  %1193 = vst [vmem:[%s2339_s17 + $0xf8] sm:$0xff] %v1065_v45  ;;  %v1067_v53 = vmul.f32 2.0, %v1721_v48  ;;  %1742 = vpow2.f32 %v1432_v38  ;;  %v1443_v44 = vmul.f32 -1.442695, %v193_v33  ;;  %v196_v45 = vld [vmem:[%s2311_s30 + $0x1d0] sm:$0xff] }
  0x8f   : > { %v1725_v56 = vpop.eup %1724  ;;  %1194 = vst [vmem:[%s2339_s17 + $0x100] sm:$0xff] %v1066_v49  ;;  %v1068_v57 = vmul.f32 2.0, %v1723_v52  ;;  %1744 = vpow2.f32 %v1433_v42  ;;  %v1444_v48 = vmul.f32 -1.442695, %v194_v37  ;;  %v197_v49 = vld [vmem:[%s2311_s30 + $0x1d8] sm:$0xff]  ;;  %v203_v37 = vld [vmem:[%s2311_s30 + $0x208] sm:$0xff] }
  0x90   : > { %v1727_v59 = vpop.eup %1726  ;;  %1195 = vst [vmem:[%s2339_s17 + $0x108] sm:$0xff] %v1067_v53  ;;  %v1069_v60 = vmul.f32 2.0, %v1725_v56  ;;  %1746 = vpow2.f32 %v1434_v46  ;;  %v1445_v52 = vmul.f32 -1.442695, %v195_v41  ;;  %v198_v53 = vld [vmem:[%s2311_s30 + $0x1e0] sm:$0xff] }
  0x91   : > { %v1729_v62 = vpop.eup %1728  ;;  %1196 = vst [vmem:[%s2339_s17 + $0x110] sm:$0xff] %v1068_v57  ;;  %v1070_v63 = vmul.f32 2.0, %v1727_v59  ;;  %1748 = vpow2.f32 %v1435_v50  ;;  %v1446_v56 = vmul.f32 -1.442695, %v196_v45  ;;  %v199_v57 = vld [vmem:[%s2311_s30 + $0x1e8] sm:$0xff] }
  0x92   : > { %v1731_v1 = vpop.eup %1730  ;;  %1197 = vst [vmem:[%s2339_s17 + $0x118] sm:$0xff] %v1069_v60  ;;  %v1071_v2 = vmul.f32 2.0, %v1729_v62  ;;  %1750 = vpow2.f32 %v1436_v54  ;;  %v1447_v60 = vmul.f32 -1.442695, %v197_v49 }
  0x93   : > { %v1733_v3 = vpop.eup %1732  ;;  %1198 = vst [vmem:[%s2339_s17 + $0x120] sm:$0xff] %v1070_v63  ;;  %v1072_v4 = vmul.f32 2.0, %v1731_v1  ;;  %1752 = vpow2.f32 %v1437_v58  ;;  %v201_v1 = vld [vmem:[%s2311_s30 + $0x1f8] sm:$0xff] }
  0x94   : > { %v1735_v5 = vpop.eup %1734  ;;  %1199 = vst [vmem:[%s2339_s17 + $0x128] sm:$0xff] %v1071_v2  ;;  %v689_v6 = vadd.f32 1.0, %v1733_v3  ;;  %1754 = vpow2.f32 %v1438_v61  ;;  %v200_v61 = vld [vmem:[%s2311_s30 + $0x1f0] sm:$0xff] }
  0x95   : > { %v1737_v7 = vpop.eup %1736  ;;  %1200 = vst [vmem:[%s2339_s17 + $0x130] sm:$0xff] %v1072_v4  ;;  %v690_v8 = vadd.f32 1.0, %v1735_v5  ;;  %1756 = vpow2.f32 %v1439_v0  ;;  %v1448_v0 = vmul.f32 -1.442695, %v198_v53  ;;  %v1449_v4 = vmul.f32 -1.442695, %v199_v57 }
  0x96   : > { %v1739_v9 = vpop.eup %1738  ;;  %1758 = vrcp.f32 %v689_v6  ;;  %v691_v10 = vadd.f32 1.0, %v1737_v7  ;;  %v202_v5 = vld [vmem:[%s2311_s30 + $0x200] sm:$0xff] }
  0x97   : > { %v1741_v11 = vpop.eup %1740  ;;  %1760 = vrcp.f32 %v690_v8  ;;  %v692_v12 = vadd.f32 1.0, %v1739_v9  ;;  %v1450_v8 = vmul.f32 -1.442695, %v200_v61 }
  0x98   : > { %v1743_v13 = vpop.eup %1742  ;;  %1762 = vrcp.f32 %v691_v10  ;;  %v693_v14 = vadd.f32 1.0, %v1741_v11  ;;  %v1451_v11 = vmul.f32 -1.442695, %v201_v1 }
  0x99   : > { %v1745_v15 = vpop.eup %1744  ;;  %1764 = vrcp.f32 %v692_v12  ;;  %v694_v16 = vadd.f32 1.0, %v1743_v13 }
  0x9a   : > { %v1747_v17 = vpop.eup %1746  ;;  %1766 = vrcp.f32 %v693_v14  ;;  %v695_v18 = vadd.f32 1.0, %v1745_v15  ;;  %v1452_v14 = vmul.f32 -1.442695, %v202_v5 }
  0x9b   : > { %v1749_v19 = vpop.eup %1748  ;;  %1768 = vrcp.f32 %v694_v16  ;;  %v696_v20 = vadd.f32 1.0, %v1747_v17 }
  0x9c   : > { %v1751_v21 = vpop.eup %1750  ;;  %1770 = vrcp.f32 %v695_v18  ;;  %v697_v22 = vadd.f32 1.0, %v1749_v19 }
  0x9d   : > { %v1753_v24 = vpop.eup %1752  ;;  %1772 = vrcp.f32 %v696_v20  ;;  %v698_v25 = vadd.f32 1.0, %v1751_v21 }
  0x9e   : > { %v1755_v27 = vpop.eup %1754  ;;  %1774 = vrcp.f32 %v697_v22  ;;  %v699_v28 = vadd.f32 1.0, %v1753_v24 }
  0x9f   : > { %v1757_v30 = vpop.eup %1756  ;;  %1776 = vrcp.f32 %v698_v25  ;;  %v700_v31 = vadd.f32 1.0, %v1755_v27 }
  0xa0   : > { %v1759_v34 = vpop.eup %1758  ;;  %1778 = vrcp.f32 %v699_v28  ;;  %v701_v35 = vadd.f32 1.0, %v1757_v30 }
  0xa1   : > { %v1761_v38 = vpop.eup %1760  ;;  %v1073_v39 = vmul.f32 2.0, %v1759_v34  ;;  %1780 = vrcp.f32 %v700_v31 }
  0xa2   : > { %v1763_v42 = vpop.eup %1762  ;;  %v1074_v43 = vmul.f32 2.0, %v1761_v38  ;;  %1782 = vrcp.f32 %v701_v35 }
  0xa3   : > { %v1765_v46 = vpop.eup %1764  ;;  %1201 = vst [vmem:[%s2339_s17 + $0x138] sm:$0xff] %v1073_v39  ;;  %v1075_v47 = vmul.f32 2.0, %v1763_v42  ;;  %1784 = vpow2.f32 %v1440_v32 }
  0xa4   : > { %v1767_v50 = vpop.eup %1766  ;;  %1202 = vst [vmem:[%s2339_s17 + $0x140] sm:$0xff] %v1074_v43  ;;  %v1076_v51 = vmul.f32 2.0, %v1765_v46  ;;  %1786 = vpow2.f32 %v1441_v36  ;;  %v205_v43 = vld [vmem:[%s2311_s30 + $0x218] sm:$0xff]  ;;  %v1453_v46 = vmul.f32 -1.442695, %v203_v37 }
  0xa5   : > { %v1769_v54 = vpop.eup %1768  ;;  %1203 = vst [vmem:[%s2339_s17 + $0x148] sm:$0xff] %v1075_v47  ;;  %v1077_v55 = vmul.f32 2.0, %v1767_v50  ;;  %1788 = vpow2.f32 %v1442_v40  ;;  %v204_v40 = vld [vmem:[%s2311_s30 + $0x210] sm:$0xff]  ;;  %v206_v47 = vld [vmem:[%s2311_s30 + $0x220] sm:$0xff] }
  0xa6   : > { %v1771_v58 = vpop.eup %1770  ;;  %1204 = vst [vmem:[%s2339_s17 + $0x150] sm:$0xff] %v1076_v51  ;;  %v1078_v59 = vmul.f32 2.0, %v1769_v54  ;;  %1790 = vpow2.f32 %v1443_v44  ;;  %v1454_v50 = vmul.f32 -1.442695, %v204_v40  ;;  %v207_v51 = vld [vmem:[%s2311_s30 + $0x228] sm:$0xff] }
  0xa7   : > { %v1773_v62 = vpop.eup %1772  ;;  %1205 = vst [vmem:[%s2339_s17 + $0x158] sm:$0xff] %v1077_v55  ;;  %v1079_v63 = vmul.f32 2.0, %v1771_v58  ;;  %1792 = vpow2.f32 %v1444_v48  ;;  %v1455_v54 = vmul.f32 -1.442695, %v205_v43  ;;  %v208_v55 = vld [vmem:[%s2311_s30 + $0x230] sm:$0xff] }
  0xa8   : > { %v1775_v2 = vpop.eup %1774  ;;  %1206 = vst [vmem:[%s2339_s17 + $0x160] sm:$0xff] %v1078_v59  ;;  %v1080_v3 = vmul.f32 2.0, %v1773_v62  ;;  %1794 = vpow2.f32 %v1445_v52  ;;  %v1456_v58 = vmul.f32 -1.442695, %v206_v47  ;;  %v209_v59 = vld [vmem:[%s2311_s30 + $0x238] sm:$0xff] }
  0xa9   : > { %v1777_v6 = vpop.eup %1776  ;;  %1207 = vst [vmem:[%s2339_s17 + $0x168] sm:$0xff] %v1079_v63  ;;  %v1081_v7 = vmul.f32 2.0, %v1775_v2  ;;  %1796 = vpow2.f32 %v1446_v56  ;;  %v1457_v62 = vmul.f32 -1.442695, %v207_v51  ;;  %v210_v63 = vld [vmem:[%s2311_s30 + $0x240] sm:$0xff]  ;;  %v216_v51 = vld [vmem:[%s2311_s30 + $0x270] sm:$0xff] }
  0xaa   : > { %v1779_v9 = vpop.eup %1778  ;;  %1208 = vst [vmem:[%s2339_s17 + $0x170] sm:$0xff] %v1080_v3  ;;  %v1082_v10 = vmul.f32 2.0, %v1777_v6  ;;  %1798 = vpow2.f32 %v1447_v60  ;;  %v1458_v2 = vmul.f32 -1.442695, %v208_v55  ;;  %v211_v3 = vld [vmem:[%s2311_s30 + $0x248] sm:$0xff] }
  0xab   : > { %v1781_v12 = vpop.eup %1780  ;;  %1209 = vst [vmem:[%s2339_s17 + $0x178] sm:$0xff] %v1081_v7  ;;  %v1083_v13 = vmul.f32 2.0, %v1779_v9  ;;  %1800 = vpow2.f32 %v1448_v0  ;;  %v1459_v6 = vmul.f32 -1.442695, %v209_v59  ;;  %v212_v7 = vld [vmem:[%s2311_s30 + $0x250] sm:$0xff] }
  0xac   : > { %v1783_v15 = vpop.eup %1782  ;;  %1210 = vst [vmem:[%s2339_s17 + $0x180] sm:$0xff] %v1082_v10  ;;  %v1084_v16 = vmul.f32 2.0, %v1781_v12  ;;  %1802 = vpow2.f32 %v1449_v4  ;;  %v1460_v10 = vmul.f32 -1.442695, %v210_v63 }
  0xad   : > { %v1785_v17 = vpop.eup %1784  ;;  %1211 = vst [vmem:[%s2339_s17 + $0x188] sm:$0xff] %v1083_v13  ;;  %v1085_v18 = vmul.f32 2.0, %v1783_v15  ;;  %1804 = vpow2.f32 %v1450_v8  ;;  %v214_v15 = vld [vmem:[%s2311_s30 + $0x260] sm:$0xff] }
  0xae   : > { %v1787_v19 = vpop.eup %1786  ;;  %1212 = vst [vmem:[%s2339_s17 + $0x190] sm:$0xff] %v1084_v16  ;;  %v702_v20 = vadd.f32 1.0, %v1785_v17  ;;  %1806 = vpow2.f32 %v1451_v11  ;;  %v213_v11 = vld [vmem:[%s2311_s30 + $0x258] sm:$0xff] }
  0xaf   : > { %v1789_v21 = vpop.eup %1788  ;;  %1213 = vst [vmem:[%s2339_s17 + $0x198] sm:$0xff] %v1085_v18  ;;  %v703_v22 = vadd.f32 1.0, %v1787_v19  ;;  %1808 = vpow2.f32 %v1452_v14  ;;  %v1461_v14 = vmul.f32 -1.442695, %v211_v3  ;;  %v1462_v18 = vmul.f32 -1.442695, %v212_v7 }
  0xb0   : > { %v1791_v23 = vpop.eup %1790  ;;  %1810 = vrcp.f32 %v702_v20  ;;  %v704_v24 = vadd.f32 1.0, %v1789_v21  ;;  %v215_v19 = vld [vmem:[%s2311_s30 + $0x268] sm:$0xff] }
  0xb1   : > { %v1793_v25 = vpop.eup %1792  ;;  %1812 = vrcp.f32 %v703_v22  ;;  %v705_v26 = vadd.f32 1.0, %v1791_v23  ;;  %v1463_v22 = vmul.f32 -1.442695, %v213_v11 }
  0xb2   : > { %v1795_v27 = vpop.eup %1794  ;;  %1814 = vrcp.f32 %v704_v24  ;;  %v706_v28 = vadd.f32 1.0, %v1793_v25  ;;  %v1464_v25 = vmul.f32 -1.442695, %v214_v15 }
  0xb3   : > { %v1797_v29 = vpop.eup %1796  ;;  %1816 = vrcp.f32 %v705_v26  ;;  %v707_v30 = vadd.f32 1.0, %v1795_v27 }
  0xb4   : > { %v1799_v31 = vpop.eup %1798  ;;  %1818 = vrcp.f32 %v706_v28  ;;  %v708_v32 = vadd.f32 1.0, %v1797_v29  ;;  %v1465_v28 = vmul.f32 -1.442695, %v215_v19 }
  0xb5   : > { %v1801_v33 = vpop.eup %1800  ;;  %1820 = vrcp.f32 %v707_v30  ;;  %v709_v34 = vadd.f32 1.0, %v1799_v31 }
  0xb6   : > { %v1803_v35 = vpop.eup %1802  ;;  %1822 = vrcp.f32 %v708_v32  ;;  %v710_v36 = vadd.f32 1.0, %v1801_v33 }
  0xb7   : > { %v1805_v38 = vpop.eup %1804  ;;  %1824 = vrcp.f32 %v709_v34  ;;  %v711_v39 = vadd.f32 1.0, %v1803_v35 }
  0xb8   : > { %v1807_v41 = vpop.eup %1806  ;;  %1826 = vrcp.f32 %v710_v36  ;;  %v712_v42 = vadd.f32 1.0, %v1805_v38 }
  0xb9   : > { %v1809_v44 = vpop.eup %1808  ;;  %1828 = vrcp.f32 %v711_v39  ;;  %v713_v45 = vadd.f32 1.0, %v1807_v41 }
  0xba   : > { %v1811_v48 = vpop.eup %1810  ;;  %1830 = vrcp.f32 %v712_v42  ;;  %v714_v49 = vadd.f32 1.0, %v1809_v44 }
  0xbb   : > { %v1813_v52 = vpop.eup %1812  ;;  %v1086_v53 = vmul.f32 2.0, %v1811_v48  ;;  %1832 = vrcp.f32 %v713_v45 }
  0xbc   : > { %v1815_v56 = vpop.eup %1814  ;;  %v1087_v57 = vmul.f32 2.0, %v1813_v52  ;;  %1834 = vrcp.f32 %v714_v49 }
  0xbd   : > { %v1817_v60 = vpop.eup %1816  ;;  %1214 = vst [vmem:[%s2339_s17 + $0x1a0] sm:$0xff] %v1086_v53  ;;  %v1088_v61 = vmul.f32 2.0, %v1815_v56  ;;  %1836 = vpow2.f32 %v1453_v46 }
  0xbe   : > { %v1819_v0 = vpop.eup %1818  ;;  %1215 = vst [vmem:[%s2339_s17 + $0x1a8] sm:$0xff] %v1087_v57  ;;  %v1089_v1 = vmul.f32 2.0, %v1817_v60  ;;  %1838 = vpow2.f32 %v1454_v50  ;;  %v218_v57 = vld [vmem:[%s2311_s30 + $0x280] sm:$0xff]  ;;  %v1466_v60 = vmul.f32 -1.442695, %v216_v51 }
  0xbf   : > { %v1821_v4 = vpop.eup %1820  ;;  %1216 = vst [vmem:[%s2339_s17 + $0x1b0] sm:$0xff] %v1088_v61  ;;  %v1090_v5 = vmul.f32 2.0, %v1819_v0  ;;  %1840 = vpow2.f32 %v1455_v54  ;;  %v217_v54 = vld [vmem:[%s2311_s30 + $0x278] sm:$0xff]  ;;  %v219_v61 = vld [vmem:[%s2311_s30 + $0x288] sm:$0xff] }
  0xc0   : > { %v1823_v8 = vpop.eup %1822  ;;  %1217 = vst [vmem:[%s2339_s17 + $0x1b8] sm:$0xff] %v1089_v1  ;;  %v1091_v9 = vmul.f32 2.0, %v1821_v4  ;;  %1842 = vpow2.f32 %v1456_v58  ;;  %v1467_v0 = vmul.f32 -1.442695, %v217_v54  ;;  %v220_v1 = vld [vmem:[%s2311_s30 + $0x290] sm:$0xff] }
  0xc1   : > { %v1825_v12 = vpop.eup %1824  ;;  %1218 = vst [vmem:[%s2339_s17 + $0x1c0] sm:$0xff] %v1090_v5  ;;  %v1092_v13 = vmul.f32 2.0, %v1823_v8  ;;  %1844 = vpow2.f32 %v1457_v62  ;;  %v1468_v4 = vmul.f32 -1.442695, %v218_v57  ;;  %v221_v5 = vld [vmem:[%s2311_s30 + $0x298] sm:$0xff] }
  0xc2   : > { %v1827_v16 = vpop.eup %1826  ;;  %1219 = vst [vmem:[%s2339_s17 + $0x1c8] sm:$0xff] %v1091_v9  ;;  %v1093_v17 = vmul.f32 2.0, %v1825_v12  ;;  %1846 = vpow2.f32 %v1458_v2  ;;  %v1469_v8 = vmul.f32 -1.442695, %v219_v61  ;;  %v222_v9 = vld [vmem:[%s2311_s30 + $0x2a0] sm:$0xff] }
  0xc3   : > { %v1829_v20 = vpop.eup %1828  ;;  %1220 = vst [vmem:[%s2339_s17 + $0x1d0] sm:$0xff] %v1092_v13  ;;  %v1094_v21 = vmul.f32 2.0, %v1827_v16  ;;  %1848 = vpow2.f32 %v1459_v6  ;;  %v1470_v12 = vmul.f32 -1.442695, %v220_v1  ;;  %v223_v13 = vld [vmem:[%s2311_s30 + $0x2a8] sm:$0xff]  ;;  %v229_v1 = vld [vmem:[%s2311_s30 + $0x2d8] sm:$0xff] }
  0xc4   : > { %v1831_v23 = vpop.eup %1830  ;;  %1221 = vst [vmem:[%s2339_s17 + $0x1d8] sm:$0xff] %v1093_v17  ;;  %v1095_v24 = vmul.f32 2.0, %v1829_v20  ;;  %1850 = vpow2.f32 %v1460_v10  ;;  %v1471_v16 = vmul.f32 -1.442695, %v221_v5  ;;  %v224_v17 = vld [vmem:[%s2311_s30 + $0x2b0] sm:$0xff] }
  0xc5   : > { %v1833_v26 = vpop.eup %1832  ;;  %1222 = vst [vmem:[%s2339_s17 + $0x1e0] sm:$0xff] %v1094_v21  ;;  %v1096_v27 = vmul.f32 2.0, %v1831_v23  ;;  %1852 = vpow2.f32 %v1461_v14  ;;  %v1472_v20 = vmul.f32 -1.442695, %v222_v9  ;;  %v225_v21 = vld [vmem:[%s2311_s30 + $0x2b8] sm:$0xff] }
  0xc6   : > { %v1835_v29 = vpop.eup %1834  ;;  %1223 = vst [vmem:[%s2339_s17 + $0x1e8] sm:$0xff] %v1095_v24  ;;  %v1097_v30 = vmul.f32 2.0, %v1833_v26  ;;  %1854 = vpow2.f32 %v1462_v18  ;;  %v1473_v24 = vmul.f32 -1.442695, %v223_v13 }
  0xc7   : > { %v1837_v31 = vpop.eup %1836  ;;  %1224 = vst [vmem:[%s2339_s17 + $0x1f0] sm:$0xff] %v1096_v27  ;;  %v1098_v32 = vmul.f32 2.0, %v1835_v29  ;;  %1856 = vpow2.f32 %v1463_v22  ;;  %v227_v29 = vld [vmem:[%s2311_s30 + $0x2c8] sm:$0xff] }
  0xc8   : > { %v1839_v33 = vpop.eup %1838  ;;  %1225 = vst [vmem:[%s2339_s17 + $0x1f8] sm:$0xff] %v1097_v30  ;;  %v715_v34 = vadd.f32 1.0, %v1837_v31  ;;  %1858 = vpow2.f32 %v1464_v25  ;;  %v226_v25 = vld [vmem:[%s2311_s30 + $0x2c0] sm:$0xff] }
  0xc9   : > { %v1841_v35 = vpop.eup %1840  ;;  %1226 = vst [vmem:[%s2339_s17 + $0x200] sm:$0xff] %v1098_v32  ;;  %v716_v36 = vadd.f32 1.0, %v1839_v33  ;;  %1860 = vpow2.f32 %v1465_v28  ;;  %v1474_v28 = vmul.f32 -1.442695, %v224_v17  ;;  %v1475_v32 = vmul.f32 -1.442695, %v225_v21 }
  0xca   : > { %v1843_v37 = vpop.eup %1842  ;;  %1862 = vrcp.f32 %v715_v34  ;;  %v717_v38 = vadd.f32 1.0, %v1841_v35  ;;  %v228_v33 = vld [vmem:[%s2311_s30 + $0x2d0] sm:$0xff] }
  0xcb   : > { %v1845_v39 = vpop.eup %1844  ;;  %1864 = vrcp.f32 %v716_v36  ;;  %v718_v40 = vadd.f32 1.0, %v1843_v37  ;;  %v1476_v36 = vmul.f32 -1.442695, %v226_v25 }
  0xcc   : > { %v1847_v41 = vpop.eup %1846  ;;  %1866 = vrcp.f32 %v717_v38  ;;  %v719_v42 = vadd.f32 1.0, %v1845_v39  ;;  %v1477_v39 = vmul.f32 -1.442695, %v227_v29 }
  0xcd   : > { %v1849_v43 = vpop.eup %1848  ;;  %1868 = vrcp.f32 %v718_v40  ;;  %v720_v44 = vadd.f32 1.0, %v1847_v41 }
  0xce   : > { %v1851_v45 = vpop.eup %1850  ;;  %1870 = vrcp.f32 %v719_v42  ;;  %v721_v46 = vadd.f32 1.0, %v1849_v43  ;;  %v1478_v42 = vmul.f32 -1.442695, %v228_v33 }
  0xcf   : > { %v1853_v47 = vpop.eup %1852  ;;  %1872 = vrcp.f32 %v720_v44  ;;  %v722_v48 = vadd.f32 1.0, %v1851_v45 }
  0xd0   : > { %v1855_v49 = vpop.eup %1854  ;;  %1874 = vrcp.f32 %v721_v46  ;;  %v723_v50 = vadd.f32 1.0, %v1853_v47 }
  0xd1   : > { %v1857_v52 = vpop.eup %1856  ;;  %1876 = vrcp.f32 %v722_v48  ;;  %v724_v53 = vadd.f32 1.0, %v1855_v49 }
  0xd2   : > { %v1859_v55 = vpop.eup %1858  ;;  %1878 = vrcp.f32 %v723_v50  ;;  %v725_v56 = vadd.f32 1.0, %v1857_v52 }
  0xd3   : > { %v1861_v58 = vpop.eup %1860  ;;  %1880 = vrcp.f32 %v724_v53  ;;  %v726_v59 = vadd.f32 1.0, %v1859_v55 }
  0xd4   : > { %v1863_v62 = vpop.eup %1862  ;;  %1882 = vrcp.f32 %v725_v56  ;;  %v727_v63 = vadd.f32 1.0, %v1861_v58 }
  0xd5   : > { %v1865_v2 = vpop.eup %1864  ;;  %v1099_v3 = vmul.f32 2.0, %v1863_v62  ;;  %1884 = vrcp.f32 %v726_v59 }
  0xd6   : > { %v1867_v6 = vpop.eup %1866  ;;  %v1100_v7 = vmul.f32 2.0, %v1865_v2  ;;  %1886 = vrcp.f32 %v727_v63 }
  0xd7   : > { %v1869_v10 = vpop.eup %1868  ;;  %1227 = vst [vmem:[%s2339_s17 + $0x208] sm:$0xff] %v1099_v3  ;;  %v1101_v11 = vmul.f32 2.0, %v1867_v6  ;;  %1888 = vpow2.f32 %v1466_v60 }
  0xd8   : > { %v1871_v14 = vpop.eup %1870  ;;  %1228 = vst [vmem:[%s2339_s17 + $0x210] sm:$0xff] %v1100_v7  ;;  %v1102_v15 = vmul.f32 2.0, %v1869_v10  ;;  %1890 = vpow2.f32 %v1467_v0  ;;  %v231_v7 = vld [vmem:[%s2311_s30 + $0x2e8] sm:$0xff]  ;;  %v1479_v10 = vmul.f32 -1.442695, %v229_v1 }
  0xd9   : > { %v1873_v18 = vpop.eup %1872  ;;  %1229 = vst [vmem:[%s2339_s17 + $0x218] sm:$0xff] %v1101_v11  ;;  %v1103_v19 = vmul.f32 2.0, %v1871_v14  ;;  %1892 = vpow2.f32 %v1468_v4  ;;  %v230_v4 = vld [vmem:[%s2311_s30 + $0x2e0] sm:$0xff]  ;;  %v232_v11 = vld [vmem:[%s2311_s30 + $0x2f0] sm:$0xff] }
  0xda   : > { %v1875_v22 = vpop.eup %1874  ;;  %1230 = vst [vmem:[%s2339_s17 + $0x220] sm:$0xff] %v1102_v15  ;;  %v1104_v23 = vmul.f32 2.0, %v1873_v18  ;;  %1894 = vpow2.f32 %v1469_v8  ;;  %v1480_v14 = vmul.f32 -1.442695, %v230_v4  ;;  %v233_v15 = vld [vmem:[%s2311_s30 + $0x2f8] sm:$0xff] }
  0xdb   : > { %v1877_v26 = vpop.eup %1876  ;;  %1231 = vst [vmem:[%s2339_s17 + $0x228] sm:$0xff] %v1103_v19  ;;  %v1105_v27 = vmul.f32 2.0, %v1875_v22  ;;  %1896 = vpow2.f32 %v1470_v12  ;;  %v1481_v18 = vmul.f32 -1.442695, %v231_v7  ;;  %v234_v19 = vld [vmem:[%s2311_s30 + $0x300] sm:$0xff] }
  0xdc   : > { %v1879_v30 = vpop.eup %1878  ;;  %1232 = vst [vmem:[%s2339_s17 + $0x230] sm:$0xff] %v1104_v23  ;;  %v1106_v31 = vmul.f32 2.0, %v1877_v26  ;;  %1898 = vpow2.f32 %v1471_v16  ;;  %v1482_v22 = vmul.f32 -1.442695, %v232_v11  ;;  %v235_v23 = vld [vmem:[%s2311_s30 + $0x308] sm:$0xff] }
  0xdd   : > { %v1881_v34 = vpop.eup %1880  ;;  %1233 = vst [vmem:[%s2339_s17 + $0x238] sm:$0xff] %v1105_v27  ;;  %v1107_v35 = vmul.f32 2.0, %v1879_v30  ;;  %1900 = vpow2.f32 %v1472_v20  ;;  %v1483_v26 = vmul.f32 -1.442695, %v233_v15  ;;  %v236_v27 = vld [vmem:[%s2311_s30 + $0x310] sm:$0xff]  ;;  %v242_v15 = vld [vmem:[%s2311_s30 + $0x340] sm:$0xff] }
  0xde   : > { %v1883_v37 = vpop.eup %1882  ;;  %1234 = vst [vmem:[%s2339_s17 + $0x240] sm:$0xff] %v1106_v31  ;;  %v1108_v38 = vmul.f32 2.0, %v1881_v34  ;;  %1902 = vpow2.f32 %v1473_v24  ;;  %v1484_v30 = vmul.f32 -1.442695, %v234_v19  ;;  %v237_v31 = vld [vmem:[%s2311_s30 + $0x318] sm:$0xff] }
  0xdf   : > { %v1885_v40 = vpop.eup %1884  ;;  %1235 = vst [vmem:[%s2339_s17 + $0x248] sm:$0xff] %v1107_v35  ;;  %v1109_v41 = vmul.f32 2.0, %v1883_v37  ;;  %1904 = vpow2.f32 %v1474_v28  ;;  %v1485_v34 = vmul.f32 -1.442695, %v235_v23  ;;  %v238_v35 = vld [vmem:[%s2311_s30 + $0x320] sm:$0xff] }
  0xe0   : > { %v1887_v43 = vpop.eup %1886  ;;  %1236 = vst [vmem:[%s2339_s17 + $0x250] sm:$0xff] %v1108_v38  ;;  %v1110_v44 = vmul.f32 2.0, %v1885_v40  ;;  %1906 = vpow2.f32 %v1475_v32  ;;  %v1486_v38 = vmul.f32 -1.442695, %v236_v27 }
  0xe1   : > { %v1889_v45 = vpop.eup %1888  ;;  %1237 = vst [vmem:[%s2339_s17 + $0x258] sm:$0xff] %v1109_v41  ;;  %v1111_v46 = vmul.f32 2.0, %v1887_v43  ;;  %1908 = vpow2.f32 %v1476_v36  ;;  %v240_v43 = vld [vmem:[%s2311_s30 + $0x330] sm:$0xff] }
  0xe2   : > { %v1891_v47 = vpop.eup %1890  ;;  %1238 = vst [vmem:[%s2339_s17 + $0x260] sm:$0xff] %v1110_v44  ;;  %v728_v48 = vadd.f32 1.0, %v1889_v45  ;;  %1910 = vpow2.f32 %v1477_v39  ;;  %v239_v39 = vld [vmem:[%s2311_s30 + $0x328] sm:$0xff] }
  0xe3   : > { %v1893_v49 = vpop.eup %1892  ;;  %1239 = vst [vmem:[%s2339_s17 + $0x268] sm:$0xff] %v1111_v46  ;;  %v729_v50 = vadd.f32 1.0, %v1891_v47  ;;  %1912 = vpow2.f32 %v1478_v42  ;;  %v1487_v42 = vmul.f32 -1.442695, %v237_v31  ;;  %v1488_v46 = vmul.f32 -1.442695, %v238_v35 }
  0xe4   : > { %v1895_v51 = vpop.eup %1894  ;;  %1914 = vrcp.f32 %v728_v48  ;;  %v730_v52 = vadd.f32 1.0, %v1893_v49  ;;  %v241_v47 = vld [vmem:[%s2311_s30 + $0x338] sm:$0xff] }
  0xe5   : > { %v1897_v53 = vpop.eup %1896  ;;  %1916 = vrcp.f32 %v729_v50  ;;  %v731_v54 = vadd.f32 1.0, %v1895_v51  ;;  %v1489_v50 = vmul.f32 -1.442695, %v239_v39 }
  0xe6   : > { %v1899_v55 = vpop.eup %1898  ;;  %1918 = vrcp.f32 %v730_v52  ;;  %v732_v56 = vadd.f32 1.0, %v1897_v53  ;;  %v1490_v53 = vmul.f32 -1.442695, %v240_v43 }
  0xe7   : > { %v1901_v57 = vpop.eup %1900  ;;  %1920 = vrcp.f32 %v731_v54  ;;  %v733_v58 = vadd.f32 1.0, %v1899_v55 }
  0xe8   : > { %v1903_v59 = vpop.eup %1902  ;;  %1922 = vrcp.f32 %v732_v56  ;;  %v734_v60 = vadd.f32 1.0, %v1901_v57  ;;  %v1491_v56 = vmul.f32 -1.442695, %v241_v47 }
  0xe9   : > { %v1905_v61 = vpop.eup %1904  ;;  %1924 = vrcp.f32 %v733_v58  ;;  %v735_v62 = vadd.f32 1.0, %v1903_v59 }
  0xea   : > { %v1907_v63 = vpop.eup %1906  ;;  %1926 = vrcp.f32 %v734_v60  ;;  %v736_v0 = vadd.f32 1.0, %v1905_v61 }
  0xeb   : > { %v1909_v2 = vpop.eup %1908  ;;  %1928 = vrcp.f32 %v735_v62  ;;  %v737_v3 = vadd.f32 1.0, %v1907_v63 }
  0xec   : > { %v1911_v5 = vpop.eup %1910  ;;  %1930 = vrcp.f32 %v736_v0  ;;  %v738_v6 = vadd.f32 1.0, %v1909_v2 }
  0xed   : > { %v1913_v8 = vpop.eup %1912  ;;  %1932 = vrcp.f32 %v737_v3  ;;  %v739_v9 = vadd.f32 1.0, %v1911_v5 }
  0xee   : > { %v1915_v12 = vpop.eup %1914  ;;  %1934 = vrcp.f32 %v738_v6  ;;  %v740_v13 = vadd.f32 1.0, %v1913_v8 }
  0xef   : > { %v1917_v16 = vpop.eup %1916  ;;  %v1112_v17 = vmul.f32 2.0, %v1915_v12  ;;  %1936 = vrcp.f32 %v739_v9 }
  0xf0   : > { %v1919_v20 = vpop.eup %1918  ;;  %v1113_v21 = vmul.f32 2.0, %v1917_v16  ;;  %1938 = vrcp.f32 %v740_v13 }
  0xf1   : > { %v1921_v24 = vpop.eup %1920  ;;  %1240 = vst [vmem:[%s2339_s17 + $0x270] sm:$0xff] %v1112_v17  ;;  %v1114_v25 = vmul.f32 2.0, %v1919_v20  ;;  %1940 = vpow2.f32 %v1479_v10 }
  0xf2   : > { %v1923_v28 = vpop.eup %1922  ;;  %1241 = vst [vmem:[%s2339_s17 + $0x278] sm:$0xff] %v1113_v21  ;;  %v1115_v29 = vmul.f32 2.0, %v1921_v24  ;;  %1942 = vpow2.f32 %v1480_v14  ;;  %v244_v21 = vld [vmem:[%s2311_s30 + $0x350] sm:$0xff]  ;;  %v1492_v24 = vmul.f32 -1.442695, %v242_v15 }
  0xf3   : > { %v1925_v32 = vpop.eup %1924  ;;  %1242 = vst [vmem:[%s2339_s17 + $0x280] sm:$0xff] %v1114_v25  ;;  %v1116_v33 = vmul.f32 2.0, %v1923_v28  ;;  %1944 = vpow2.f32 %v1481_v18  ;;  %v243_v18 = vld [vmem:[%s2311_s30 + $0x348] sm:$0xff]  ;;  %v245_v25 = vld [vmem:[%s2311_s30 + $0x358] sm:$0xff] }
  0xf4   : > { %v1927_v36 = vpop.eup %1926  ;;  %1243 = vst [vmem:[%s2339_s17 + $0x288] sm:$0xff] %v1115_v29  ;;  %v1117_v37 = vmul.f32 2.0, %v1925_v32  ;;  %1946 = vpow2.f32 %v1482_v22  ;;  %v1493_v28 = vmul.f32 -1.442695, %v243_v18  ;;  %v246_v29 = vld [vmem:[%s2311_s30 + $0x360] sm:$0xff] }
  0xf5   : > { %v1929_v40 = vpop.eup %1928  ;;  %1244 = vst [vmem:[%s2339_s17 + $0x290] sm:$0xff] %v1116_v33  ;;  %v1118_v41 = vmul.f32 2.0, %v1927_v36  ;;  %1948 = vpow2.f32 %v1483_v26  ;;  %v1494_v32 = vmul.f32 -1.442695, %v244_v21  ;;  %v247_v33 = vld [vmem:[%s2311_s30 + $0x368] sm:$0xff] }
  0xf6   : > { %v1931_v44 = vpop.eup %1930  ;;  %1245 = vst [vmem:[%s2339_s17 + $0x298] sm:$0xff] %v1117_v37  ;;  %v1119_v45 = vmul.f32 2.0, %v1929_v40  ;;  %1950 = vpow2.f32 %v1484_v30  ;;  %v1495_v36 = vmul.f32 -1.442695, %v245_v25  ;;  %v248_v37 = vld [vmem:[%s2311_s30 + $0x370] sm:$0xff] }
  0xf7   : > { %v1933_v48 = vpop.eup %1932  ;;  %1246 = vst [vmem:[%s2339_s17 + $0x2a0] sm:$0xff] %v1118_v41  ;;  %v1120_v49 = vmul.f32 2.0, %v1931_v44  ;;  %1952 = vpow2.f32 %v1485_v34  ;;  %v1496_v40 = vmul.f32 -1.442695, %v246_v29  ;;  %v249_v41 = vld [vmem:[%s2311_s30 + $0x378] sm:$0xff]  ;;  %v255_v29 = vld [vmem:[%s2311_s30 + $0x3a8] sm:$0xff] }
  0xf8   : > { %v1935_v51 = vpop.eup %1934  ;;  %1247 = vst [vmem:[%s2339_s17 + $0x2a8] sm:$0xff] %v1119_v45  ;;  %v1121_v52 = vmul.f32 2.0, %v1933_v48  ;;  %1954 = vpow2.f32 %v1486_v38  ;;  %v1497_v44 = vmul.f32 -1.442695, %v247_v33  ;;  %v250_v45 = vld [vmem:[%s2311_s30 + $0x380] sm:$0xff] }
  0xf9   : > { %v1937_v54 = vpop.eup %1936  ;;  %1248 = vst [vmem:[%s2339_s17 + $0x2b0] sm:$0xff] %v1120_v49  ;;  %v1122_v55 = vmul.f32 2.0, %v1935_v51  ;;  %1956 = vpow2.f32 %v1487_v42  ;;  %v1498_v48 = vmul.f32 -1.442695, %v248_v37  ;;  %v251_v49 = vld [vmem:[%s2311_s30 + $0x388] sm:$0xff] }
  0xfa   : > { %v1939_v57 = vpop.eup %1938  ;;  %1249 = vst [vmem:[%s2339_s17 + $0x2b8] sm:$0xff] %v1121_v52  ;;  %v1123_v58 = vmul.f32 2.0, %v1937_v54  ;;  %1958 = vpow2.f32 %v1488_v46  ;;  %v1499_v52 = vmul.f32 -1.442695, %v249_v41 }
  0xfb   : > { %v1941_v59 = vpop.eup %1940  ;;  %1250 = vst [vmem:[%s2339_s17 + $0x2c0] sm:$0xff] %v1122_v55  ;;  %v1124_v60 = vmul.f32 2.0, %v1939_v57  ;;  %1960 = vpow2.f32 %v1489_v50  ;;  %v253_v57 = vld [vmem:[%s2311_s30 + $0x398] sm:$0xff] }
  0xfc   : > { %v1943_v61 = vpop.eup %1942  ;;  %1251 = vst [vmem:[%s2339_s17 + $0x2c8] sm:$0xff] %v1123_v58  ;;  %v741_v62 = vadd.f32 1.0, %v1941_v59  ;;  %1962 = vpow2.f32 %v1490_v53  ;;  %v252_v53 = vld [vmem:[%s2311_s30 + $0x390] sm:$0xff] }
  0xfd   : > { %v1945_v63 = vpop.eup %1944  ;;  %1252 = vst [vmem:[%s2339_s17 + $0x2d0] sm:$0xff] %v1124_v60  ;;  %v742_v0 = vadd.f32 1.0, %v1943_v61  ;;  %1964 = vpow2.f32 %v1491_v56  ;;  %v1500_v56 = vmul.f32 -1.442695, %v250_v45  ;;  %v1501_v60 = vmul.f32 -1.442695, %v251_v49 }
  0xfe   : > { %v1947_v1 = vpop.eup %1946  ;;  %1966 = vrcp.f32 %v741_v62  ;;  %v743_v2 = vadd.f32 1.0, %v1945_v63  ;;  %v254_v61 = vld [vmem:[%s2311_s30 + $0x3a0] sm:$0xff] }
  0xff   : > { %v1949_v3 = vpop.eup %1948  ;;  %1968 = vrcp.f32 %v742_v0  ;;  %v744_v4 = vadd.f32 1.0, %v1947_v1  ;;  %v1502_v0 = vmul.f32 -1.442695, %v252_v53 }
 0x100   : > { %v1951_v5 = vpop.eup %1950  ;;  %1970 = vrcp.f32 %v743_v2  ;;  %v745_v6 = vadd.f32 1.0, %v1949_v3  ;;  %v1503_v3 = vmul.f32 -1.442695, %v253_v57 }
 0x101   : > { %v1953_v7 = vpop.eup %1952  ;;  %1972 = vrcp.f32 %v744_v4  ;;  %v746_v8 = vadd.f32 1.0, %v1951_v5 }
 0x102   : > { %v1955_v9 = vpop.eup %1954  ;;  %1974 = vrcp.f32 %v745_v6  ;;  %v747_v10 = vadd.f32 1.0, %v1953_v7  ;;  %v1504_v6 = vmul.f32 -1.442695, %v254_v61 }
 0x103   : > { %v1957_v11 = vpop.eup %1956  ;;  %1976 = vrcp.f32 %v746_v8  ;;  %v748_v12 = vadd.f32 1.0, %v1955_v9 }
 0x104   : > { %v1959_v13 = vpop.eup %1958  ;;  %1978 = vrcp.f32 %v747_v10  ;;  %v749_v14 = vadd.f32 1.0, %v1957_v11 }
 0x105   : > { %v1961_v16 = vpop.eup %1960  ;;  %1980 = vrcp.f32 %v748_v12  ;;  %v750_v17 = vadd.f32 1.0, %v1959_v13 }
 0x106   : > { %v1963_v19 = vpop.eup %1962  ;;  %1982 = vrcp.f32 %v749_v14  ;;  %v751_v20 = vadd.f32 1.0, %v1961_v16 }
 0x107   : > { %v1965_v22 = vpop.eup %1964  ;;  %1984 = vrcp.f32 %v750_v17  ;;  %v752_v23 = vadd.f32 1.0, %v1963_v19 }
 0x108   : > { %v1967_v26 = vpop.eup %1966  ;;  %1986 = vrcp.f32 %v751_v20  ;;  %v753_v27 = vadd.f32 1.0, %v1965_v22 }
 0x109   : > { %v1969_v30 = vpop.eup %1968  ;;  %v1125_v31 = vmul.f32 2.0, %v1967_v26  ;;  %1988 = vrcp.f32 %v752_v23 }
 0x10a   : > { %v1971_v34 = vpop.eup %1970  ;;  %v1126_v35 = vmul.f32 2.0, %v1969_v30  ;;  %1990 = vrcp.f32 %v753_v27 }
 0x10b   : > { %v1973_v38 = vpop.eup %1972  ;;  %1253 = vst [vmem:[%s2339_s17 + $0x2d8] sm:$0xff] %v1125_v31  ;;  %v1127_v39 = vmul.f32 2.0, %v1971_v34  ;;  %1992 = vpow2.f32 %v1492_v24 }
 0x10c   : > { %v1975_v42 = vpop.eup %1974  ;;  %1254 = vst [vmem:[%s2339_s17 + $0x2e0] sm:$0xff] %v1126_v35  ;;  %v1128_v43 = vmul.f32 2.0, %v1973_v38  ;;  %1994 = vpow2.f32 %v1493_v28  ;;  %v257_v35 = vld [vmem:[%s2311_s30 + $0x3b8] sm:$0xff]  ;;  %v1505_v38 = vmul.f32 -1.442695, %v255_v29 }
 0x10d   : > { %v1977_v46 = vpop.eup %1976  ;;  %1255 = vst [vmem:[%s2339_s17 + $0x2e8] sm:$0xff] %v1127_v39  ;;  %v1129_v47 = vmul.f32 2.0, %v1975_v42  ;;  %1996 = vpow2.f32 %v1494_v32  ;;  %v256_v32 = vld [vmem:[%s2311_s30 + $0x3b0] sm:$0xff]  ;;  %v258_v39 = vld [vmem:[%s2311_s30 + $0x3c0] sm:$0xff] }
 0x10e   : > { %v1979_v50 = vpop.eup %1978  ;;  %1256 = vst [vmem:[%s2339_s17 + $0x2f0] sm:$0xff] %v1128_v43  ;;  %v1130_v51 = vmul.f32 2.0, %v1977_v46  ;;  %1998 = vpow2.f32 %v1495_v36  ;;  %v1506_v42 = vmul.f32 -1.442695, %v256_v32  ;;  %v259_v43 = vld [vmem:[%s2311_s30 + $0x3c8] sm:$0xff] }
 0x10f   : > { %v1981_v54 = vpop.eup %1980  ;;  %1257 = vst [vmem:[%s2339_s17 + $0x2f8] sm:$0xff] %v1129_v47  ;;  %v1131_v55 = vmul.f32 2.0, %v1979_v50  ;;  %2000 = vpow2.f32 %v1496_v40  ;;  %v1507_v46 = vmul.f32 -1.442695, %v257_v35  ;;  %v260_v47 = vld [vmem:[%s2311_s30 + $0x3d0] sm:$0xff] }
 0x110   : > { %v1983_v58 = vpop.eup %1982  ;;  %1258 = vst [vmem:[%s2339_s17 + $0x300] sm:$0xff] %v1130_v51  ;;  %v1132_v59 = vmul.f32 2.0, %v1981_v54  ;;  %2002 = vpow2.f32 %v1497_v44  ;;  %v1508_v50 = vmul.f32 -1.442695, %v258_v39  ;;  %v261_v51 = vld [vmem:[%s2311_s30 + $0x3d8] sm:$0xff] }
 0x111   : > { %v1985_v62 = vpop.eup %1984  ;;  %1259 = vst [vmem:[%s2339_s17 + $0x308] sm:$0xff] %v1131_v55  ;;  %v1133_v63 = vmul.f32 2.0, %v1983_v58  ;;  %2004 = vpow2.f32 %v1498_v48  ;;  %v1509_v54 = vmul.f32 -1.442695, %v259_v43  ;;  %v262_v55 = vld [vmem:[%s2311_s30 + $0x3e0] sm:$0xff] }
 0x112   : > { %v1987_v1 = vpop.eup %1986  ;;  %1260 = vst [vmem:[%s2339_s17 + $0x310] sm:$0xff] %v1132_v59  ;;  %v1134_v2 = vmul.f32 2.0, %v1985_v62  ;;  %2006 = vpow2.f32 %v1499_v52  ;;  %v1510_v58 = vmul.f32 -1.442695, %v260_v47  ;;  %v263_v59 = vld [vmem:[%s2311_s30 + $0x3e8] sm:$0xff] }
 0x113   : > { %v1989_v4 = vpop.eup %1988  ;;  %1261 = vst [vmem:[%s2339_s17 + $0x318] sm:$0xff] %v1133_v63  ;;  %v1135_v5 = vmul.f32 2.0, %v1987_v1  ;;  %2008 = vpow2.f32 %v1500_v56  ;;  %v1511_v62 = vmul.f32 -1.442695, %v261_v51  ;;  %v264_v63 = vld [vmem:[%s2311_s30 + $0x3f0] sm:$0xff] }
 0x114   : > { %v1991_v7 = vpop.eup %1990  ;;  %1262 = vst [vmem:[%s2339_s17 + $0x320] sm:$0xff] %v1134_v2  ;;  %v1136_v8 = vmul.f32 2.0, %v1989_v4  ;;  %2010 = vpow2.f32 %v1501_v60  ;;  %v1512_v2 = vmul.f32 -1.442695, %v262_v55 }
 0x115   : > { %v1993_v9 = vpop.eup %1992  ;;  %1263 = vst [vmem:[%s2339_s17 + $0x328] sm:$0xff] %v1135_v5  ;;  %v1137_v10 = vmul.f32 2.0, %v1991_v7  ;;  %2012 = vpow2.f32 %v1502_v0 }
 0x116   : > { %v1995_v11 = vpop.eup %1994  ;;  %1264 = vst [vmem:[%s2339_s17 + $0x330] sm:$0xff] %v1136_v8  ;;  %v754_v12 = vadd.f32 1.0, %v1993_v9  ;;  %2014 = vpow2.f32 %v1503_v3  ;;  %v265_v3 = vld [vmem:[%s2311_s30 + $0x3f8] sm:$0xff]  ;;  %v1514_v9 = vmul.f32 -1.442695, %v264_v63 }
 0x117   : > { %v1997_v13 = vpop.eup %1996  ;;  %1265 = vst [vmem:[%s2339_s17 + $0x338] sm:$0xff] %v1137_v10  ;;  %v755_v14 = vadd.f32 1.0, %v1995_v11  ;;  %2016 = vpow2.f32 %v1504_v6  ;;  %v1513_v6 = vmul.f32 -1.442695, %v263_v59 }
 0x118   : > { %v1999_v15 = vpop.eup %1998  ;;  %2018 = vrcp.f32 %v754_v12  ;;  %v756_v16 = vadd.f32 1.0, %v1997_v13  ;;  %v1515_v12 = vmul.f32 -1.442695, %v265_v3 }
 0x119   : > { %v2001_v17 = vpop.eup %2000  ;;  %2020 = vrcp.f32 %v755_v14  ;;  %v757_v18 = vadd.f32 1.0, %v1999_v15 }
 0x11a   : > { %v2003_v19 = vpop.eup %2002  ;;  %2022 = vrcp.f32 %v756_v16  ;;  %v758_v20 = vadd.f32 1.0, %v2001_v17 }
 0x11b   : > { %v2005_v21 = vpop.eup %2004  ;;  %2024 = vrcp.f32 %v757_v18  ;;  %v759_v22 = vadd.f32 1.0, %v2003_v19 }
 0x11c   : > { %v2007_v23 = vpop.eup %2006  ;;  %2026 = vrcp.f32 %v758_v20  ;;  %v760_v24 = vadd.f32 1.0, %v2005_v21 }
 0x11d   : > { %v2009_v25 = vpop.eup %2008  ;;  %2028 = vrcp.f32 %v759_v22  ;;  %v761_v26 = vadd.f32 1.0, %v2007_v23 }
 0x11e   : > { %v2011_v27 = vpop.eup %2010  ;;  %2030 = vrcp.f32 %v760_v24  ;;  %v762_v28 = vadd.f32 1.0, %v2009_v25 }
 0x11f   : > { %v2013_v30 = vpop.eup %2012  ;;  %2032 = vrcp.f32 %v761_v26  ;;  %v763_v31 = vadd.f32 1.0, %v2011_v27 }
 0x120   : > { %v2015_v33 = vpop.eup %2014  ;;  %2034 = vrcp.f32 %v762_v28  ;;  %v764_v34 = vadd.f32 1.0, %v2013_v30 }
 0x121   : > { %v2017_v36 = vpop.eup %2016  ;;  %2036 = vrcp.f32 %v763_v31  ;;  %v765_v37 = vadd.f32 1.0, %v2015_v33 }
 0x122   : > { %v2019_v40 = vpop.eup %2018  ;;  %2038 = vrcp.f32 %v764_v34  ;;  %v766_v41 = vadd.f32 1.0, %v2017_v36 }
 0x123   : > { %v2021_v44 = vpop.eup %2020  ;;  %v1138_v45 = vmul.f32 2.0, %v2019_v40  ;;  %2040 = vrcp.f32 %v765_v37 }
 0x124   : > { %v2023_v48 = vpop.eup %2022  ;;  %v1139_v49 = vmul.f32 2.0, %v2021_v44  ;;  %2042 = vrcp.f32 %v766_v41 }
 0x125   : > { %v2025_v52 = vpop.eup %2024  ;;  %1266 = vst [vmem:[%s2339_s17 + $0x340] sm:$0xff] %v1138_v45  ;;  %v1140_v53 = vmul.f32 2.0, %v2023_v48  ;;  %2044 = vpow2.f32 %v1505_v38 }
 0x126   : > { %v2027_v56 = vpop.eup %2026  ;;  %1267 = vst [vmem:[%s2339_s17 + $0x348] sm:$0xff] %v1139_v49  ;;  %v1141_v57 = vmul.f32 2.0, %v2025_v52  ;;  %2046 = vpow2.f32 %v1506_v42 }
 0x127   : > { %v2029_v60 = vpop.eup %2028  ;;  %1268 = vst [vmem:[%s2339_s17 + $0x350] sm:$0xff] %v1140_v53  ;;  %v1142_v61 = vmul.f32 2.0, %v2027_v56  ;;  %2048 = vpow2.f32 %v1507_v46 }
 0x128   : > { %v2031_v0 = vpop.eup %2030  ;;  %1269 = vst [vmem:[%s2339_s17 + $0x358] sm:$0xff] %v1141_v57  ;;  %v1143_v1 = vmul.f32 2.0, %v2029_v60  ;;  %2050 = vpow2.f32 %v1508_v50 }
 0x129   : > { %v2033_v4 = vpop.eup %2032  ;;  %1270 = vst [vmem:[%s2339_s17 + $0x360] sm:$0xff] %v1142_v61  ;;  %v1144_v5 = vmul.f32 2.0, %v2031_v0  ;;  %2052 = vpow2.f32 %v1509_v54 }
 0x12a   : > { %v2035_v7 = vpop.eup %2034  ;;  %1271 = vst [vmem:[%s2339_s17 + $0x368] sm:$0xff] %v1143_v1  ;;  %v1145_v8 = vmul.f32 2.0, %v2033_v4  ;;  %2054 = vpow2.f32 %v1510_v58 }
 0x12b   : > { %v2037_v10 = vpop.eup %2036  ;;  %1272 = vst [vmem:[%s2339_s17 + $0x370] sm:$0xff] %v1144_v5  ;;  %v1146_v11 = vmul.f32 2.0, %v2035_v7  ;;  %2056 = vpow2.f32 %v1511_v62 }
 0x12c   : > { %v2039_v13 = vpop.eup %2038  ;;  %1273 = vst [vmem:[%s2339_s17 + $0x378] sm:$0xff] %v1145_v8  ;;  %v1147_v14 = vmul.f32 2.0, %v2037_v10  ;;  %2058 = vpow2.f32 %v1512_v2 }
 0x12d   : > { %v2041_v15 = vpop.eup %2040  ;;  %1274 = vst [vmem:[%s2339_s17 + $0x380] sm:$0xff] %v1146_v11  ;;  %v1148_v16 = vmul.f32 2.0, %v2039_v13  ;;  %2060 = vpow2.f32 %v1513_v6 }
 0x12e   : > { %v2043_v17 = vpop.eup %2042  ;;  %1275 = vst [vmem:[%s2339_s17 + $0x388] sm:$0xff] %v1147_v14  ;;  %v1149_v18 = vmul.f32 2.0, %v2041_v15  ;;  %2062 = vpow2.f32 %v1514_v9 }
 0x12f   : > { %v2045_v19 = vpop.eup %2044  ;;  %1276 = vst [vmem:[%s2339_s17 + $0x390] sm:$0xff] %v1148_v16  ;;  %v1150_v20 = vmul.f32 2.0, %v2043_v17  ;;  %2064 = vpow2.f32 %v1515_v12 }
 0x130   : > { %v2047_v21 = vpop.eup %2046  ;;  %1277 = vst [vmem:[%s2339_s17 + $0x398] sm:$0xff] %v1149_v18  ;;  %v767_v22 = vadd.f32 1.0, %v2045_v19 }
 0x131   : > { %v2049_v23 = vpop.eup %2048  ;;  %1278 = vst [vmem:[%s2339_s17 + $0x3a0] sm:$0xff] %v1150_v20  ;;  %v768_v24 = vadd.f32 1.0, %v2047_v21 }
 0x132   : > { %v2051_v25 = vpop.eup %2050  ;;  %2066 = vrcp.f32 %v767_v22  ;;  %v769_v26 = vadd.f32 1.0, %v2049_v23 }
 0x133   : > { %v2053_v27 = vpop.eup %2052  ;;  %2068 = vrcp.f32 %v768_v24  ;;  %v770_v28 = vadd.f32 1.0, %v2051_v25 }
 0x134   : > { %v2055_v29 = vpop.eup %2054  ;;  %2070 = vrcp.f32 %v769_v26  ;;  %v771_v30 = vadd.f32 1.0, %v2053_v27 }
 0x135   : > { %v2057_v31 = vpop.eup %2056  ;;  %2072 = vrcp.f32 %v770_v28  ;;  %v772_v32 = vadd.f32 1.0, %v2055_v29 }
 0x136   : > { %v2059_v33 = vpop.eup %2058  ;;  %2074 = vrcp.f32 %v771_v30  ;;  %v773_v34 = vadd.f32 1.0, %v2057_v31 }
 0x137   : > { %v2061_v35 = vpop.eup %2060  ;;  %2076 = vrcp.f32 %v772_v32  ;;  %v774_v36 = vadd.f32 1.0, %v2059_v33 }
 0x138   : > { %v2063_v37 = vpop.eup %2062  ;;  %2078 = vrcp.f32 %v773_v34  ;;  %v775_v38 = vadd.f32 1.0, %v2061_v35 }
 0x139   : > { %v2065_v39 = vpop.eup %2064  ;;  %2080 = vrcp.f32 %v774_v36  ;;  %v776_v40 = vadd.f32 1.0, %v2063_v37 }
 0x13a   : > { %2082 = vrcp.f32 %v775_v38  ;;  %v777_v41 = vadd.f32 1.0, %v2065_v39 }
 0x13b   : > { %2084 = vrcp.f32 %v776_v40 }
 0x13c   : > { %v2067_v42 = vpop.eup %2066  ;;  %2086 = vrcp.f32 %v777_v41 }
 0x13d   : > { %v2069_v43 = vpop.eup %2068  ;;  %v1151_v44 = vmul.f32 2.0, %v2067_v42 }
 0x13e   : > { %v2071_v45 = vpop.eup %2070  ;;  %v1152_v46 = vmul.f32 2.0, %v2069_v43 }
 0x13f   : > { %v2073_v47 = vpop.eup %2072  ;;  %1279 = vst [vmem:[%s2339_s17 + $0x3a8] sm:$0xff] %v1151_v44  ;;  %v1153_v48 = vmul.f32 2.0, %v2071_v45 }
 0x140   : > { %v2075_v49 = vpop.eup %2074  ;;  %1280 = vst [vmem:[%s2339_s17 + $0x3b0] sm:$0xff] %v1152_v46  ;;  %v1154_v50 = vmul.f32 2.0, %v2073_v47 }
 0x141   : > { %v2077_v51 = vpop.eup %2076  ;;  %1281 = vst [vmem:[%s2339_s17 + $0x3b8] sm:$0xff] %v1153_v48  ;;  %v1155_v52 = vmul.f32 2.0, %v2075_v49 }
 0x142   : > { %v2079_v53 = vpop.eup %2078  ;;  %1282 = vst [vmem:[%s2339_s17 + $0x3c0] sm:$0xff] %v1154_v50  ;;  %v1156_v54 = vmul.f32 2.0, %v2077_v51 }
 0x143   : > { %v2081_v55 = vpop.eup %2080  ;;  %1283 = vst [vmem:[%s2339_s17 + $0x3c8] sm:$0xff] %v1155_v52  ;;  %v1157_v56 = vmul.f32 2.0, %v2079_v53 }
 0x144   : > { %v2083_v57 = vpop.eup %2082  ;;  %1284 = vst [vmem:[%s2339_s17 + $0x3d0] sm:$0xff] %v1156_v54  ;;  %v1158_v58 = vmul.f32 2.0, %v2081_v55 }
 0x145   : > { %v2085_v59 = vpop.eup %2084  ;;  %1285 = vst [vmem:[%s2339_s17 + $0x3d8] sm:$0xff] %v1157_v56  ;;  %v1159_v60 = vmul.f32 2.0, %v2083_v57 }
 0x146   : > { %v2087_v61 = vpop.eup %2086  ;;  %1286 = vst [vmem:[%s2339_s17 + $0x3e0] sm:$0xff] %v1158_v58  ;;  %v1160_v62 = vmul.f32 2.0, %v2085_v59 }
 0x147   : > { %1287 = vst [vmem:[%s2339_s17 + $0x3e8] sm:$0xff] %v1159_v60  ;;  %v1161_v63 = vmul.f32 2.0, %v2087_v61 }
 0x148   : > { %1288 = vst [vmem:[%s2339_s17 + $0x3f0] sm:$0xff] %v1160_v62 }
 0x149   : > { %1289 = vst [vmem:[%s2339_s17 + $0x3f8] sm:$0xff] %v1161_v63 }
 0x14a   : > { %2131 = shalt.err (!%p2128_p1)
}
 0x14b   : > { %s2132_s13 = scalar_lea.hbm %s2579_s2, 16384  ;;  %s2136_s20 = scalar_lea.hbm %s2628_s1, 65536 }
 0x14c   : > { %p2133_p3 = scmp.ne.s32.totalorder %s2579_s2, %s2132_s13  ;;  %p2137_p0 = scmp.lt.u32.totalorder %s2579_s2, %s2628_s1 }
 0x14d   : > { %p2138_p2 = scmp.lt.u32.totalorder %s2136_s20, %s2132_s13  ;;  %p2140_p6 = scmp.lt.u32.totalorder %s2132_s13, %s2579_s2 }
 0x14e   : > { %p2134_p4 = pnand %p2133_p3, %p2635_p10 }
 0x14f   : > { %p2139_p7 = por %p2138_p2, %p2137_p0 }
 0x150   : > { %p2135_p5 = pneg %p2134_p4 }
 0x151   : > { %p2141_p11 = por %p2140_p6, %p2139_p7 }
 0x153   : > { %p2142_p12 = pnand %p2141_p11, %p2135_p5 }
 0x155   : > { %2145 = shalt.err (!%p2142_p12)
}
 0x156   : > { %s2190_s24 = smov 1024   ;;  %s2191_s26 = smov 64  }
 0x157   : > { %1528 = dma.vmem_to_hbm [thread:$0]  (%p2635_p10), %s2581_s27, 16384, %s2579_s2, %s1291_s10, %s2190_s24, %s2190_s24, %s2191_s26  }
 0x158 PF: > { %p1539_p8 = scmp.ge.s32.totalorder %s2184_s9, 2  ;;  %s1320_s30 = sand.u32 1, %s2172_s6  }
 0x159   : > { %p2636_p9 = scmp.ne.s32.totalorder %s2633_s19, 0  ;;  %s1321_s17 = scalar_lea.sflag [#allocation4], %s1320_s30 }
 0x15b   : > { %p1535_p13 = pnand %p1539_p8, %p2636_p9 }
 0x15d   : > { %2167 = dma.done.wait (!%p1535_p13), %s1321_s17, 16384  }
 0x15e   : > { %2169 = vsyncadd (!%p1535_p13), %s1321_s17, 4294950912  ;;  %p14_p1 = scmp.ge.s32.totalorder %s2227_s12, 6   ;;  %s2637_s6 = smov %s2176_s7 }
 0x15f   : > { %s2638_s7 = smov %s2180_s8  ;;  %s2639_s8 = smov %s2239_s15 }
 0x160   : > { %s2640_s9 = smov %s2227_s12  ;;  %16 = sbr.rel (!%p14_p1) target bundleno = 5 (0x5), region = 69 }
 0x167   :  { %1326 = vsyncpa [#allocation3], 1 }
 0x168   :  { %1328 = vsyncpa [#allocation3 + $0x1], 1 }
 0x169   :  { %1329 = vsyncpa [#allocation4], 1 }
 0x16a   :  { %1331 = vsyncpa [#allocation4 + $0x1], 1 }

</bundles_post_ra>
